<compile_context>
chip_gen: v6e
topology: v6e:2x2x1
jax: 0.10.0
libtpu: 0.0.40
codegen_flags: <defaults>
</compile_context>

<pallas_src>
import jax
import jax.numpy as jnp
from jax.experimental import pallas as pl
from jax.experimental.pallas import tpu as pltpu


# ----------------------------- Pallas kernel ---------------------------------
def _lstm2_wavefront_kernel(x2d_ref, wih0_ref, wcat_ref, whh1_ref,
                            b0_ref, b1_ref, scale_ref, offset_ref,
                            h0_ref, c0_ref,
                            y_ref, hn_ref, cn_ref):
    """Whole 2-layer LSTM forward (wavefront schedule) in one invocation.

    x2d_ref  : (S*B, E)   time-major input, leading dims pre-flattened
    wih0_ref : (E, 4H)    layer-0 input weights,  gate order (i, f, o, g),
                          i/f/o columns pre-scaled by 0.5
    wcat_ref : (H, 8H)    [whh0 | wih1]  (same reorder + scaling)
    whh1_ref : (H, 4H)    layer-1 recurrent weights
    b0/b1    : (1, 4H)    fused (b_ih + b_hh) biases (reordered + scaled)
    scale    : (1, 4H)    0.5 on i/f/o lanes, 1.0 on g lanes
    offset   : (1, 4H)    0.5 on i/f/o lanes, 0.0 on g lanes
    h0/c0    : (2, B, H)  initial states of both layers
    y_ref    : (S, B, H)  per-step layer-1 hidden
    hn/cn    : (2, B, H)  final states
    """
    S, B, H = y_ref.shape
    H4 = 4 * H

    # Hoist weights / constants once (register resident).
    wih0 = wih0_ref[...]
    wcat = wcat_ref[...]
    whh1 = whh1_ref[...]
    b0 = b0_ref[...]
    b1 = b1_ref[...]
    scale = scale_ref[...]
    offset = offset_ref[...]

    # Layer-0 input projection for all timesteps in one MXU matmul,
    # off the sequential critical path:  (S*B, E) @ (E, 4H) + b0.
    xg0 = jnp.dot(x2d_ref[...], wih0, preferred_element_type=jnp.float32) + b0

    def cell_update(act, c_prev):
        # act = [sigmoid(i) | sigmoid(f) | sigmoid(o) | tanh(g)]   (B, 4H)
        i = act[:, 0 * H:1 * H]
        f = act[:, 1 * H:2 * H]
        o = act[:, 2 * H:3 * H]
        g = act[:, 3 * H:4 * H]
        c_new = f * c_prev + i * g
        h_new = o * jnp.tanh(c_new)
        return h_new, c_new

    h0 = h0_ref[0]
    c0 = c0_ref[0]
    h1 = h0_ref[1]
    c1 = c0_ref[1]

    # ---- prologue: layer-0 step 0 -------------------------------------------
    comb = jnp.dot(h0, wcat, preferred_element_type=jnp.float32)      # (B, 8H)
    pre0 = comb[:, :H4] + xg0[0:B]
    a0 = scale * jnp.tanh(pre0) + offset                              # 1 EUP pass
    h0, c0 = cell_update(a0, c0)

    # ---- waves: layer-0 step w+1 and layer-1 step w share one MXU matmul -----
    # TODO(synk): inter-layer dropout(p=0.5) of training-mode nn.LSTM is
    #             omitted (eval-mode / deterministic forward semantics).
    for w in range(S - 1):  # tiny S — fully unrolled at trace time
        comb = jnp.dot(h0, wcat, preferred_element_type=jnp.float32)  # (B, 8H)
        # Layer-1 recurrent term — off the h0 critical path.
        g1_extra = jnp.dot(h1, whh1, preferred_element_type=jnp.float32) + b1
        pre0 = comb[:, :H4] + xg0[(w + 1) * B:(w + 2) * B]
        pre1 = comb[:, H4:] + g1_extra
        a0 = scale * jnp.tanh(pre0) + offset
        a1 = scale * jnp.tanh(pre1) + offset
        h0, c0 = cell_update(a0, c0)        # layer-0, step w+1
        h1, c1 = cell_update(a1, c1)        # layer-1, step w
        y_ref[w] = h1

    # ---- epilogue: layer-1 step S-1 ------------------------------------------
    comb = jnp.dot(h0, wcat, preferred_element_type=jnp.float32)
    pre1 = comb[:, H4:] + jnp.dot(h1, whh1,
                                  preferred_element_type=jnp.float32) + b1
    a1 = scale * jnp.tanh(pre1) + offset
    h1, c1 = cell_update(a1, c1)
    y_ref[S - 1] = h1

    hn_ref[0] = h0
    hn_ref[1] = h1
    cn_ref[0] = c0
    cn_ref[1] = c1


# ------------------------------ Wrapper ---------------------------------------
def _prep_gates(w, hidden_size):
    """PyTorch gate order (i, f, g, o) along axis 0 -> kernel order (i, f, o, g),
    with the i/f/o blocks pre-scaled by 0.5 (single-tanh activation trick:
    sigmoid(z) = 0.5*tanh(z/2) + 0.5)."""
    H = hidden_size
    i, f, g, o = (w[0 * H:1 * H], w[1 * H:2 * H],
                  w[2 * H:3 * H], w[3 * H:4 * H])
    return jnp.concatenate([0.5 * i, 0.5 * f, 0.5 * o, g], axis=0)


def encoder_forward(enc_input, params, h_0, c_0):
    """enc_input: (S, B, E). params: PyTorch nn.LSTM-shaped weights/biases.

    Returns (encode_output, (h_n, c_n)) like the PyTorch module.
    """
    (w_ih_l0, w_hh_l0, b_ih_l0, b_hh_l0,
     w_ih_l1, w_hh_l1, b_ih_l1, b_hh_l1) = params
    S, B, E = enc_input.shape
    H = w_hh_l0.shape[1]

    wih0 = _prep_gates(w_ih_l0, H).T                      # (E, 4H)
    whh0 = _prep_gates(w_hh_l0, H).T                      # (H, 4H)
    wih1 = _prep_gates(w_ih_l1, H).T                      # (H, 4H)
    whh1 = _prep_gates(w_hh_l1, H).T                      # (H, 4H)
    wcat = jnp.concatenate([whh0, wih1], axis=1)          # (H, 8H) fused weights
    b0 = _prep_gates(b_ih_l0 + b_hh_l0, H).reshape(1, 4 * H)
    b1 = _prep_gates(b_ih_l1 + b_hh_l1, H).reshape(1, 4 * H)

    # Hoisted per-lane activation constants (i/f/o lanes vs g lanes).
    half = jnp.full((1, H), 0.5, jnp.float32)
    ones = jnp.ones((1, H), jnp.float32)
    zeros = jnp.zeros((1, H), jnp.float32)
    scale = jnp.concatenate([half, half, half, ones], axis=1)    # (1, 4H)
    offset = jnp.concatenate([half, half, half, zeros], axis=1)  # (1, 4H)

    x2d = enc_input.reshape(S * B, E)   # free HBM reshape; avoids in-kernel reshape

    y, h_n, c_n = pl.pallas_call(
        _lstm2_wavefront_kernel,
        out_shape=(
            jax.ShapeDtypeStruct((S, B, H), jnp.float32),
            jax.ShapeDtypeStruct((2, B, H), jnp.float32),
            jax.ShapeDtypeStruct((2, B, H), jnp.float32),
        ),
        in_specs=[pl.BlockSpec(memory_space=pltpu.MemorySpace.VMEM)] * 10,
        out_specs=(pl.BlockSpec(memory_space=pltpu.MemorySpace.VMEM),) * 3,
    )(x2d, wih0, wcat, whh1, b0, b1, scale, offset, h_0, c_0)
    return y, (h_n, c_n)


# -------------------------- Pure-JAX reference --------------------------------
def encoder_reference(x, params, h_0, c_0):
    """Independent reference using PyTorch layouts and gate order (i, f, g, o)."""
    (w_ih_l0, w_hh_l0, b_ih_l0, b_hh_l0,
     w_ih_l1, w_hh_l1, b_ih_l1, b_hh_l1) = params
    H = w_hh_l0.shape[1]
    hp = jax.lax.Precision.HIGHEST

    def cell(x_t, h_prev, c_prev, w_ih, w_hh, b_ih, b_hh):
        g = (jnp.dot(x_t, w_ih.T, precision=hp)
             + jnp.dot(h_prev, w_hh.T, precision=hp) + b_ih + b_hh)
        i = jax.nn.sigmoid(g[:, 0 * H:1 * H])
        f = jax.nn.sigmoid(g[:, 1 * H:2 * H])
        gg = jnp.tanh(g[:, 2 * H:3 * H])
        o = jax.nn.sigmoid(g[:, 3 * H:4 * H])
        c_new = f * c_prev + i * gg
        return o * jnp.tanh(c_new), c_new

    def step(carry, x_t):
        h0, c0, h1, c1 = carry
        h0, c0 = cell(x_t, h0, c0, w_ih_l0, w_hh_l0, b_ih_l0, b_hh_l0)
        h1, c1 = cell(h0, h1, c1, w_ih_l1, w_hh_l1, b_ih_l1, b_hh_l1)
        return (h0, c0, h1, c1), h1

    (h0, c0, h1, c1), ys = jax.lax.scan(
        step, (h_0[0], c_0[0], h_0[1], c_0[1]), x)
    return ys, (jnp.stack([h0, h1]), jnp.stack([c0, c1]))


# --------------------------------- Main ---------------------------------------
if __name__ == "__main__":
    SEQ, BATCH = 8, 8
    IN_FEATURES, HIDDEN = 16, 32

    key = jax.random.PRNGKey(0)
    keys = jax.random.split(key, 16)
    k = 1.0 / jnp.sqrt(HIDDEN)

    def unif(kk, shape):
        return jax.random.uniform(kk, shape, jnp.float32, minval=-k, maxval=k)

    # PyTorch nn.LSTM parameter shapes (gate order i, f, g, o along 4*H).
    params = (
        unif(keys[0], (4 * HIDDEN, IN_FEATURES)),  # w_ih_l0
        unif(keys[1], (4 * HIDDEN, HIDDEN)),       # w_hh_l0
        unif(keys[2], (4 * HIDDEN,)),              # b_ih_l0
        unif(keys[3], (4 * HIDDEN,)),              # b_hh_l0
        unif(keys[4], (4 * HIDDEN, HIDDEN)),       # w_ih_l1
        unif(keys[5], (4 * HIDDEN, HIDDEN)),       # w_hh_l1
        unif(keys[6], (4 * HIDDEN,)),              # b_ih_l1
        unif(keys[7], (4 * HIDDEN,)),              # b_hh_l1
    )

    # Inputs (time-major like the PyTorch module); module draws h_0/c_0 with
    # torch.rand -> uniform [0, 1).
    enc_input = jax.random.normal(keys[8], (SEQ, BATCH, IN_FEATURES), jnp.float32)
    h_0 = jax.random.uniform(keys[9], (2, BATCH, HIDDEN), jnp.float32)
    c_0 = jax.random.uniform(keys[10], (2, BATCH, HIDDEN), jnp.float32)

    y, (h_n, c_n) = encoder_forward(enc_input, params, h_0, c_0)
    jax.block_until_ready((y, h_n, c_n))

    y_ref, (h_ref, c_ref) = encoder_reference(enc_input, params, h_0, c_0)
    assert jnp.allclose(y, y_ref, atol=1e-4, rtol=1e-4)
    assert jnp.allclose(h_n, h_ref, atol=1e-4, rtol=1e-4)
    assert jnp.allclose(c_n, c_ref, atol=1e-4, rtol=1e-4)

    print("KERNEL_OK")
</pallas_src>

<mosaic_0001>
module attributes {stable_mosaic.version = 11 : i64} {
  func.func @_lstm2_wavefront_kernel(%arg0: memref<64x16xf32, #tpu.memory_space<vmem>>, %arg1: memref<16x128xf32, #tpu.memory_space<vmem>>, %arg2: memref<32x256xf32, #tpu.memory_space<vmem>>, %arg3: memref<32x128xf32, #tpu.memory_space<vmem>>, %arg4: memref<1x128xf32, #tpu.memory_space<vmem>>, %arg5: memref<1x128xf32, #tpu.memory_space<vmem>>, %arg6: memref<1x128xf32, #tpu.memory_space<vmem>>, %arg7: memref<1x128xf32, #tpu.memory_space<vmem>>, %arg8: memref<2x8x32xf32, #tpu.memory_space<vmem>>, %arg9: memref<2x8x32xf32, #tpu.memory_space<vmem>>, %arg10: memref<8x8x32xf32, #tpu.memory_space<vmem>>, %arg11: memref<2x8x32xf32, #tpu.memory_space<vmem>>, %arg12: memref<2x8x32xf32, #tpu.memory_space<vmem>>) attributes {dimension_semantics = [], scalar_prefetch = 0 : i64, scratch_operands = 0 : i64, tpu.core_type = #tpu.core_type<tc>} {
    %c0 = arith.constant 0 : index
    %c0_0 = arith.constant 0 : index
    %0 = vector.load %arg1[%c0, %c0_0] : memref<16x128xf32, #tpu.memory_space<vmem>>, vector<16x128xf32>
    %c0_1 = arith.constant 0 : index
    %c0_2 = arith.constant 0 : index
    %1 = vector.load %arg2[%c0_1, %c0_2] : memref<32x256xf32, #tpu.memory_space<vmem>>, vector<32x256xf32>
    %c0_3 = arith.constant 0 : index
    %c0_4 = arith.constant 0 : index
    %2 = vector.load %arg3[%c0_3, %c0_4] : memref<32x128xf32, #tpu.memory_space<vmem>>, vector<32x128xf32>
    %c0_5 = arith.constant 0 : index
    %c0_6 = arith.constant 0 : index
    %3 = vector.load %arg4[%c0_5, %c0_6] : memref<1x128xf32, #tpu.memory_space<vmem>>, vector<1x128xf32>
    %c0_7 = arith.constant 0 : index
    %c0_8 = arith.constant 0 : index
    %4 = vector.load %arg5[%c0_7, %c0_8] : memref<1x128xf32, #tpu.memory_space<vmem>>, vector<1x128xf32>
    %c0_9 = arith.constant 0 : index
    %c0_10 = arith.constant 0 : index
    %5 = vector.load %arg6[%c0_9, %c0_10] : memref<1x128xf32, #tpu.memory_space<vmem>>, vector<1x128xf32>
    %c0_11 = arith.constant 0 : index
    %c0_12 = arith.constant 0 : index
    %6 = vector.load %arg7[%c0_11, %c0_12] : memref<1x128xf32, #tpu.memory_space<vmem>>, vector<1x128xf32>
    %c0_13 = arith.constant 0 : index
    %c0_14 = arith.constant 0 : index
    %7 = vector.load %arg0[%c0_13, %c0_14] : memref<64x16xf32, #tpu.memory_space<vmem>>, vector<64x16xf32>
    %cst = arith.constant dense<0.000000e+00> : vector<64x128xf32>
    %8 = tpu.matmul %7, %0, %cst {dimension_numbers = #tpu.dot_dimension_numbers<[1], [0], [0], [1], [0, 0, 1, 1], [], []>} : vector<64x16xf32>, vector<16x128xf32>, vector<64x128xf32> -> vector<64x128xf32>
    %9 = vector.broadcast %3 : vector<1x128xf32> to vector<64x128xf32>
    %10 = arith.addf %8, %9 : vector<64x128xf32>
    %c0_15 = arith.constant 0 : index
    %c0_16 = arith.constant 0 : index
    %c0_17 = arith.constant 0 : index
    %11 = vector.load %arg8[%c0_15, %c0_16, %c0_17] : memref<2x8x32xf32, #tpu.memory_space<vmem>>, vector<1x8x32xf32>
    %12 = vector.shape_cast %11 : vector<1x8x32xf32> to vector<8x32xf32>
    %c0_18 = arith.constant 0 : index
    %c0_19 = arith.constant 0 : index
    %c0_20 = arith.constant 0 : index
    %13 = vector.load %arg9[%c0_18, %c0_19, %c0_20] : memref<2x8x32xf32, #tpu.memory_space<vmem>>, vector<1x8x32xf32>
    %14 = vector.shape_cast %13 : vector<1x8x32xf32> to vector<8x32xf32>
    %c1 = arith.constant 1 : index
    %c0_21 = arith.constant 0 : index
    %c0_22 = arith.constant 0 : index
    %15 = vector.load %arg8[%c1, %c0_21, %c0_22] : memref<2x8x32xf32, #tpu.memory_space<vmem>>, vector<1x8x32xf32>
    %16 = vector.shape_cast %15 : vector<1x8x32xf32> to vector<8x32xf32>
    %c1_23 = arith.constant 1 : index
    %c0_24 = arith.constant 0 : index
    %c0_25 = arith.constant 0 : index
    %17 = vector.load %arg9[%c1_23, %c0_24, %c0_25] : memref<2x8x32xf32, #tpu.memory_space<vmem>>, vector<1x8x32xf32>
    %18 = vector.shape_cast %17 : vector<1x8x32xf32> to vector<8x32xf32>
    %cst_26 = arith.constant dense<0.000000e+00> : vector<8x256xf32>
    %19 = tpu.matmul %12, %1, %cst_26 {dimension_numbers = #tpu.dot_dimension_numbers<[1], [0], [0], [1], [0, 0, 1, 1], [], []>} : vector<8x32xf32>, vector<32x256xf32>, vector<8x256xf32> -> vector<8x256xf32>
    %20 = vector.extract_strided_slice %19 {offsets = [0, 0], sizes = [8, 128], strides = [1, 1]} : vector<8x256xf32> to vector<8x128xf32>
    %21 = vector.extract_strided_slice %10 {offsets = [0, 0], sizes = [8, 128], strides = [1, 1]} : vector<64x128xf32> to vector<8x128xf32>
    %22 = arith.addf %20, %21 : vector<8x128xf32>
    %23 = math.tanh %22 : vector<8x128xf32>
    %24 = vector.broadcast %5 : vector<1x128xf32> to vector<8x128xf32>
    %25 = arith.mulf %24, %23 : vector<8x128xf32>
    %26 = vector.broadcast %6 : vector<1x128xf32> to vector<8x128xf32>
    %27 = arith.addf %25, %26 : vector<8x128xf32>
    %28 = vector.extract_strided_slice %27 {offsets = [0, 0], sizes = [8, 32], strides = [1, 1]} : vector<8x128xf32> to vector<8x32xf32>
    %29 = vector.extract_strided_slice %27 {offsets = [0, 32], sizes = [8, 32], strides = [1, 1]} : vector<8x128xf32> to vector<8x32xf32>
    %30 = vector.extract_strided_slice %27 {offsets = [0, 64], sizes = [8, 32], strides = [1, 1]} : vector<8x128xf32> to vector<8x32xf32>
    %31 = vector.extract_strided_slice %27 {offsets = [0, 96], sizes = [8, 32], strides = [1, 1]} : vector<8x128xf32> to vector<8x32xf32>
    %32 = arith.mulf %29, %14 : vector<8x32xf32>
    %33 = arith.mulf %28, %31 : vector<8x32xf32>
    %34 = arith.addf %32, %33 : vector<8x32xf32>
    %35 = math.tanh %34 : vector<8x32xf32>
    %36 = arith.mulf %30, %35 : vector<8x32xf32>
    %cst_27 = arith.constant dense<0.000000e+00> : vector<8x256xf32>
    %37 = tpu.matmul %36, %1, %cst_27 {dimension_numbers = #tpu.dot_dimension_numbers<[1], [0], [0], [1], [0, 0, 1, 1], [], []>} : vector<8x32xf32>, vector<32x256xf32>, vector<8x256xf32> -> vector<8x256xf32>
    %cst_28 = arith.constant dense<0.000000e+00> : vector<8x128xf32>
    %38 = tpu.matmul %16, %2, %cst_28 {dimension_numbers = #tpu.dot_dimension_numbers<[1], [0], [0], [1], [0, 0, 1, 1], [], []>} : vector<8x32xf32>, vector<32x128xf32>, vector<8x128xf32> -> vector<8x128xf32>
    %39 = vector.broadcast %4 : vector<1x128xf32> to vector<8x128xf32>
    %40 = arith.addf %38, %39 : vector<8x128xf32>
    %41 = vector.extract_strided_slice %37 {offsets = [0, 0], sizes = [8, 128], strides = [1, 1]} : vector<8x256xf32> to vector<8x128xf32>
    %42 = vector.extract_strided_slice %10 {offsets = [8, 0], sizes = [8, 128], strides = [1, 1]} : vector<64x128xf32> to vector<8x128xf32>
    %43 = arith.addf %41, %42 : vector<8x128xf32>
    %44 = vector.extract_strided_slice %37 {offsets = [0, 128], sizes = [8, 128], strides = [1, 1]} : vector<8x256xf32> to vector<8x128xf32>
    %45 = arith.addf %44, %40 : vector<8x128xf32>
    %46 = math.tanh %43 : vector<8x128xf32>
    %47 = vector.broadcast %5 : vector<1x128xf32> to vector<8x128xf32>
    %48 = arith.mulf %47, %46 : vector<8x128xf32>
    %49 = vector.broadcast %6 : vector<1x128xf32> to vector<8x128xf32>
    %50 = arith.addf %48, %49 : vector<8x128xf32>
    %51 = math.tanh %45 : vector<8x128xf32>
    %52 = vector.broadcast %5 : vector<1x128xf32> to vector<8x128xf32>
    %53 = arith.mulf %52, %51 : vector<8x128xf32>
    %54 = vector.broadcast %6 : vector<1x128xf32> to vector<8x128xf32>
    %55 = arith.addf %53, %54 : vector<8x128xf32>
    %56 = vector.extract_strided_slice %50 {offsets = [0, 0], sizes = [8, 32], strides = [1, 1]} : vector<8x128xf32> to vector<8x32xf32>
    %57 = vector.extract_strided_slice %50 {offsets = [0, 32], sizes = [8, 32], strides = [1, 1]} : vector<8x128xf32> to vector<8x32xf32>
    %58 = vector.extract_strided_slice %50 {offsets = [0, 64], sizes = [8, 32], strides = [1, 1]} : vector<8x128xf32> to vector<8x32xf32>
    %59 = vector.extract_strided_slice %50 {offsets = [0, 96], sizes = [8, 32], strides = [1, 1]} : vector<8x128xf32> to vector<8x32xf32>
    %60 = arith.mulf %57, %34 : vector<8x32xf32>
    %61 = arith.mulf %56, %59 : vector<8x32xf32>
    %62 = arith.addf %60, %61 : vector<8x32xf32>
    %63 = math.tanh %62 : vector<8x32xf32>
    %64 = arith.mulf %58, %63 : vector<8x32xf32>
    %65 = vector.extract_strided_slice %55 {offsets = [0, 0], sizes = [8, 32], strides = [1, 1]} : vector<8x128xf32> to vector<8x32xf32>
    %66 = vector.extract_strided_slice %55 {offsets = [0, 32], sizes = [8, 32], strides = [1, 1]} : vector<8x128xf32> to vector<8x32xf32>
    %67 = vector.extract_strided_slice %55 {offsets = [0, 64], sizes = [8, 32], strides = [1, 1]} : vector<8x128xf32> to vector<8x32xf32>
    %68 = vector.extract_strided_slice %55 {offsets = [0, 96], sizes = [8, 32], strides = [1, 1]} : vector<8x128xf32> to vector<8x32xf32>
    %69 = arith.mulf %66, %18 : vector<8x32xf32>
    %70 = arith.mulf %65, %68 : vector<8x32xf32>
    %71 = arith.addf %69, %70 : vector<8x32xf32>
    %72 = math.tanh %71 : vector<8x32xf32>
    %73 = arith.mulf %67, %72 : vector<8x32xf32>
    %c0_29 = arith.constant 0 : index
    %c0_30 = arith.constant 0 : index
    %c0_31 = arith.constant 0 : index
    %74 = vector.load %arg10[%c0_29, %c0_30, %c0_31] : memref<8x8x32xf32, #tpu.memory_space<vmem>>, vector<1x8x32xf32>
    %75 = vector.shape_cast %74 : vector<1x8x32xf32> to vector<8x32xf32>
    %76 = vector.shape_cast %73 : vector<8x32xf32> to vector<1x8x32xf32>
    tpu.vector_store %arg10[%c0_29, %c0_30, %c0_31], %76 {strides = array<i32>} : memref<8x8x32xf32, #tpu.memory_space<vmem>>, vector<1x8x32xf32>,
    %cst_32 = arith.constant dense<0.000000e+00> : vector<8x256xf32>
    %77 = tpu.matmul %64, %1, %cst_32 {dimension_numbers = #tpu.dot_dimension_numbers<[1], [0], [0], [1], [0, 0, 1, 1], [], []>} : vector<8x32xf32>, vector<32x256xf32>, vector<8x256xf32> -> vector<8x256xf32>
    %cst_33 = arith.constant dense<0.000000e+00> : vector<8x128xf32>
    %78 = tpu.matmul %73, %2, %cst_33 {dimension_numbers = #tpu.dot_dimension_numbers<[1], [0], [0], [1], [0, 0, 1, 1], [], []>} : vector<8x32xf32>, vector<32x128xf32>, vector<8x128xf32> -> vector<8x128xf32>
    %79 = vector.broadcast %4 : vector<1x128xf32> to vector<8x128xf32>
    %80 = arith.addf %78, %79 : vector<8x128xf32>
    %81 = vector.extract_strided_slice %77 {offsets = [0, 0], sizes = [8, 128], strides = [1, 1]} : vector<8x256xf32> to vector<8x128xf32>
    %82 = vector.extract_strided_slice %10 {offsets = [16, 0], sizes = [8, 128], strides = [1, 1]} : vector<64x128xf32> to vector<8x128xf32>
    %83 = arith.addf %81, %82 : vector<8x128xf32>
    %84 = vector.extract_strided_slice %77 {offsets = [0, 128], sizes = [8, 128], strides = [1, 1]} : vector<8x256xf32> to vector<8x128xf32>
    %85 = arith.addf %84, %80 : vector<8x128xf32>
    %86 = math.tanh %83 : vector<8x128xf32>
    %87 = vector.broadcast %5 : vector<1x128xf32> to vector<8x128xf32>
    %88 = arith.mulf %87, %86 : vector<8x128xf32>
    %89 = vector.broadcast %6 : vector<1x128xf32> to vector<8x128xf32>
    %90 = arith.addf %88, %89 : vector<8x128xf32>
    %91 = math.tanh %85 : vector<8x128xf32>
    %92 = vector.broadcast %5 : vector<1x128xf32> to vector<8x128xf32>
    %93 = arith.mulf %92, %91 : vector<8x128xf32>
    %94 = vector.broadcast %6 : vector<1x128xf32> to vector<8x128xf32>
    %95 = arith.addf %93, %94 : vector<8x128xf32>
    %96 = vector.extract_strided_slice %90 {offsets = [0, 0], sizes = [8, 32], strides = [1, 1]} : vector<8x128xf32> to vector<8x32xf32>
    %97 = vector.extract_strided_slice %90 {offsets = [0, 32], sizes = [8, 32], strides = [1, 1]} : vector<8x128xf32> to vector<8x32xf32>
    %98 = vector.extract_strided_slice %90 {offsets = [0, 64], sizes = [8, 32], strides = [1, 1]} : vector<8x128xf32> to vector<8x32xf32>
    %99 = vector.extract_strided_slice %90 {offsets = [0, 96], sizes = [8, 32], strides = [1, 1]} : vector<8x128xf32> to vector<8x32xf32>
    %100 = arith.mulf %97, %62 : vector<8x32xf32>
    %101 = arith.mulf %96, %99 : vector<8x32xf32>
    %102 = arith.addf %100, %101 : vector<8x32xf32>
    %103 = math.tanh %102 : vector<8x32xf32>
    %104 = arith.mulf %98, %103 : vector<8x32xf32>
    %105 = vector.extract_strided_slice %95 {offsets = [0, 0], sizes = [8, 32], strides = [1, 1]} : vector<8x128xf32> to vector<8x32xf32>
    %106 = vector.extract_strided_slice %95 {offsets = [0, 32], sizes = [8, 32], strides = [1, 1]} : vector<8x128xf32> to vector<8x32xf32>
    %107 = vector.extract_strided_slice %95 {offsets = [0, 64], sizes = [8, 32], strides = [1, 1]} : vector<8x128xf32> to vector<8x32xf32>
    %108 = vector.extract_strided_slice %95 {offsets = [0, 96], sizes = [8, 32], strides = [1, 1]} : vector<8x128xf32> to vector<8x32xf32>
    %109 = arith.mulf %106, %71 : vector<8x32xf32>
    %110 = arith.mulf %105, %108 : vector<8x32xf32>
    %111 = arith.addf %109, %110 : vector<8x32xf32>
    %112 = math.tanh %111 : vector<8x32xf32>
    %113 = arith.mulf %107, %112 : vector<8x32xf32>
    %c1_34 = arith.constant 1 : index
    %c0_35 = arith.constant 0 : index
    %c0_36 = arith.constant 0 : index
    %114 = vector.load %arg10[%c1_34, %c0_35, %c0_36] : memref<8x8x32xf32, #tpu.memory_space<vmem>>, vector<1x8x32xf32>
    %115 = vector.shape_cast %114 : vector<1x8x32xf32> to vector<8x32xf32>
    %116 = vector.shape_cast %113 : vector<8x32xf32> to vector<1x8x32xf32>
    tpu.vector_store %arg10[%c1_34, %c0_35, %c0_36], %116 {strides = array<i32>} : memref<8x8x32xf32, #tpu.memory_space<vmem>>, vector<1x8x32xf32>,
    %cst_37 = arith.constant dense<0.000000e+00> : vector<8x256xf32>
    %117 = tpu.matmul %104, %1, %cst_37 {dimension_numbers = #tpu.dot_dimension_numbers<[1], [0], [0], [1], [0, 0, 1, 1], [], []>} : vector<8x32xf32>, vector<32x256xf32>, vector<8x256xf32> -> vector<8x256xf32>
    %cst_38 = arith.constant dense<0.000000e+00> : vector<8x128xf32>
    %118 = tpu.matmul %113, %2, %cst_38 {dimension_numbers = #tpu.dot_dimension_numbers<[1], [0], [0], [1], [0, 0, 1, 1], [], []>} : vector<8x32xf32>, vector<32x128xf32>, vector<8x128xf32> -> vector<8x128xf32>
    %119 = vector.broadcast %4 : vector<1x128xf32> to vector<8x128xf32>
    %120 = arith.addf %118, %119 : vector<8x128xf32>
    %121 = vector.extract_strided_slice %117 {offsets = [0, 0], sizes = [8, 128], strides = [1, 1]} : vector<8x256xf32> to vector<8x128xf32>
    %122 = vector.extract_strided_slice %10 {offsets = [24, 0], sizes = [8, 128], strides = [1, 1]} : vector<64x128xf32> to vector<8x128xf32>
    %123 = arith.addf %121, %122 : vector<8x128xf32>
    %124 = vector.extract_strided_slice %117 {offsets = [0, 128], sizes = [8, 128], strides = [1, 1]} : vector<8x256xf32> to vector<8x128xf32>
    %125 = arith.addf %124, %120 : vector<8x128xf32>
    %126 = math.tanh %123 : vector<8x128xf32>
    %127 = vector.broadcast %5 : vector<1x128xf32> to vector<8x128xf32>
    %128 = arith.mulf %127, %126 : vector<8x128xf32>
    %129 = vector.broadcast %6 : vector<1x128xf32> to vector<8x128xf32>
    %130 = arith.addf %128, %129 : vector<8x128xf32>
    %131 = math.tanh %125 : vector<8x128xf32>
    %132 = vector.broadcast %5 : vector<1x128xf32> to vector<8x128xf32>
    %133 = arith.mulf %132, %131 : vector<8x128xf32>
    %134 = vector.broadcast %6 : vector<1x128xf32> to vector<8x128xf32>
    %135 = arith.addf %133, %134 : vector<8x128xf32>
    %136 = vector.extract_strided_slice %130 {offsets = [0, 0], sizes = [8, 32], strides = [1, 1]} : vector<8x128xf32> to vector<8x32xf32>
    %137 = vector.extract_strided_slice %130 {offsets = [0, 32], sizes = [8, 32], strides = [1, 1]} : vector<8x128xf32> to vector<8x32xf32>
    %138 = vector.extract_strided_slice %130 {offsets = [0, 64], sizes = [8, 32], strides = [1, 1]} : vector<8x128xf32> to vector<8x32xf32>
    %139 = vector.extract_strided_slice %130 {offsets = [0, 96], sizes = [8, 32], strides = [1, 1]} : vector<8x128xf32> to vector<8x32xf32>
    %140 = arith.mulf %137, %102 : vector<8x32xf32>
    %141 = arith.mulf %136, %139 : vector<8x32xf32>
    %142 = arith.addf %140, %141 : vector<8x32xf32>
    %143 = math.tanh %142 : vector<8x32xf32>
    %144 = arith.mulf %138, %143 : vector<8x32xf32>
    %145 = vector.extract_strided_slice %135 {offsets = [0, 0], sizes = [8, 32], strides = [1, 1]} : vector<8x128xf32> to vector<8x32xf32>
    %146 = vector.extract_strided_slice %135 {offsets = [0, 32], sizes = [8, 32], strides = [1, 1]} : vector<8x128xf32> to vector<8x32xf32>
    %147 = vector.extract_strided_slice %135 {offsets = [0, 64], sizes = [8, 32], strides = [1, 1]} : vector<8x128xf32> to vector<8x32xf32>
    %148 = vector.extract_strided_slice %135 {offsets = [0, 96], sizes = [8, 32], strides = [1, 1]} : vector<8x128xf32> to vector<8x32xf32>
    %149 = arith.mulf %146, %111 : vector<8x32xf32>
    %150 = arith.mulf %145, %148 : vector<8x32xf32>
    %151 = arith.addf %149, %150 : vector<8x32xf32>
    %152 = math.tanh %151 : vector<8x32xf32>
    %153 = arith.mulf %147, %152 : vector<8x32xf32>
    %c2 = arith.constant 2 : index
    %c0_39 = arith.constant 0 : index
    %c0_40 = arith.constant 0 : index
    %154 = vector.load %arg10[%c2, %c0_39, %c0_40] : memref<8x8x32xf32, #tpu.memory_space<vmem>>, vector<1x8x32xf32>
    %155 = vector.shape_cast %154 : vector<1x8x32xf32> to vector<8x32xf32>
    %156 = vector.shape_cast %153 : vector<8x32xf32> to vector<1x8x32xf32>
    tpu.vector_store %arg10[%c2, %c0_39, %c0_40], %156 {strides = array<i32>} : memref<8x8x32xf32, #tpu.memory_space<vmem>>, vector<1x8x32xf32>,
    %cst_41 = arith.constant dense<0.000000e+00> : vector<8x256xf32>
    %157 = tpu.matmul %144, %1, %cst_41 {dimension_numbers = #tpu.dot_dimension_numbers<[1], [0], [0], [1], [0, 0, 1, 1], [], []>} : vector<8x32xf32>, vector<32x256xf32>, vector<8x256xf32> -> vector<8x256xf32>
    %cst_42 = arith.constant dense<0.000000e+00> : vector<8x128xf32>
    %158 = tpu.matmul %153, %2, %cst_42 {dimension_numbers = #tpu.dot_dimension_numbers<[1], [0], [0], [1], [0, 0, 1, 1], [], []>} : vector<8x32xf32>, vector<32x128xf32>, vector<8x128xf32> -> vector<8x128xf32>
    %159 = vector.broadcast %4 : vector<1x128xf32> to vector<8x128xf32>
    %160 = arith.addf %158, %159 : vector<8x128xf32>
    %161 = vector.extract_strided_slice %157 {offsets = [0, 0], sizes = [8, 128], strides = [1, 1]} : vector<8x256xf32> to vector<8x128xf32>
    %162 = vector.extract_strided_slice %10 {offsets = [32, 0], sizes = [8, 128], strides = [1, 1]} : vector<64x128xf32> to vector<8x128xf32>
    %163 = arith.addf %161, %162 : vector<8x128xf32>
    %164 = vector.extract_strided_slice %157 {offsets = [0, 128], sizes = [8, 128], strides = [1, 1]} : vector<8x256xf32> to vector<8x128xf32>
    %165 = arith.addf %164, %160 : vector<8x128xf32>
    %166 = math.tanh %163 : vector<8x128xf32>
    %167 = vector.broadcast %5 : vector<1x128xf32> to vector<8x128xf32>
    %168 = arith.mulf %167, %166 : vector<8x128xf32>
    %169 = vector.broadcast %6 : vector<1x128xf32> to vector<8x128xf32>
    %170 = arith.addf %168, %169 : vector<8x128xf32>
    %171 = math.tanh %165 : vector<8x128xf32>
    %172 = vector.broadcast %5 : vector<1x128xf32> to vector<8x128xf32>
    %173 = arith.mulf %172, %171 : vector<8x128xf32>
    %174 = vector.broadcast %6 : vector<1x128xf32> to vector<8x128xf32>
    %175 = arith.addf %173, %174 : vector<8x128xf32>
    %176 = vector.extract_strided_slice %170 {offsets = [0, 0], sizes = [8, 32], strides = [1, 1]} : vector<8x128xf32> to vector<8x32xf32>
    %177 = vector.extract_strided_slice %170 {offsets = [0, 32], sizes = [8, 32], strides = [1, 1]} : vector<8x128xf32> to vector<8x32xf32>
    %178 = vector.extract_strided_slice %170 {offsets = [0, 64], sizes = [8, 32], strides = [1, 1]} : vector<8x128xf32> to vector<8x32xf32>
    %179 = vector.extract_strided_slice %170 {offsets = [0, 96], sizes = [8, 32], strides = [1, 1]} : vector<8x128xf32> to vector<8x32xf32>
    %180 = arith.mulf %177, %142 : vector<8x32xf32>
    %181 = arith.mulf %176, %179 : vector<8x32xf32>
    %182 = arith.addf %180, %181 : vector<8x32xf32>
    %183 = math.tanh %182 : vector<8x32xf32>
    %184 = arith.mulf %178, %183 : vector<8x32xf32>
    %185 = vector.extract_strided_slice %175 {offsets = [0, 0], sizes = [8, 32], strides = [1, 1]} : vector<8x128xf32> to vector<8x32xf32>
    %186 = vector.extract_strided_slice %175 {offsets = [0, 32], sizes = [8, 32], strides = [1, 1]} : vector<8x128xf32> to vector<8x32xf32>
    %187 = vector.extract_strided_slice %175 {offsets = [0, 64], sizes = [8, 32], strides = [1, 1]} : vector<8x128xf32> to vector<8x32xf32>
    %188 = vector.extract_strided_slice %175 {offsets = [0, 96], sizes = [8, 32], strides = [1, 1]} : vector<8x128xf32> to vector<8x32xf32>
    %189 = arith.mulf %186, %151 : vector<8x32xf32>
    %190 = arith.mulf %185, %188 : vector<8x32xf32>
    %191 = arith.addf %189, %190 : vector<8x32xf32>
    %192 = math.tanh %191 : vector<8x32xf32>
    %193 = arith.mulf %187, %192 : vector<8x32xf32>
    %c3 = arith.constant 3 : index
    %c0_43 = arith.constant 0 : index
    %c0_44 = arith.constant 0 : index
    %194 = vector.load %arg10[%c3, %c0_43, %c0_44] : memref<8x8x32xf32, #tpu.memory_space<vmem>>, vector<1x8x32xf32>
    %195 = vector.shape_cast %194 : vector<1x8x32xf32> to vector<8x32xf32>
    %196 = vector.shape_cast %193 : vector<8x32xf32> to vector<1x8x32xf32>
    tpu.vector_store %arg10[%c3, %c0_43, %c0_44], %196 {strides = array<i32>} : memref<8x8x32xf32, #tpu.memory_space<vmem>>, vector<1x8x32xf32>,
    %cst_45 = arith.constant dense<0.000000e+00> : vector<8x256xf32>
    %197 = tpu.matmul %184, %1, %cst_45 {dimension_numbers = #tpu.dot_dimension_numbers<[1], [0], [0], [1], [0, 0, 1, 1], [], []>} : vector<8x32xf32>, vector<32x256xf32>, vector<8x256xf32> -> vector<8x256xf32>
    %cst_46 = arith.constant dense<0.000000e+00> : vector<8x128xf32>
    %198 = tpu.matmul %193, %2, %cst_46 {dimension_numbers = #tpu.dot_dimension_numbers<[1], [0], [0], [1], [0, 0, 1, 1], [], []>} : vector<8x32xf32>, vector<32x128xf32>, vector<8x128xf32> -> vector<8x128xf32>
    %199 = vector.broadcast %4 : vector<1x128xf32> to vector<8x128xf32>
    %200 = arith.addf %198, %199 : vector<8x128xf32>
    %201 = vector.extract_strided_slice %197 {offsets = [0, 0], sizes = [8, 128], strides = [1, 1]} : vector<8x256xf32> to vector<8x128xf32>
    %202 = vector.extract_strided_slice %10 {offsets = [40, 0], sizes = [8, 128], strides = [1, 1]} : vector<64x128xf32> to vector<8x128xf32>
    %203 = arith.addf %201, %202 : vector<8x128xf32>
    %204 = vector.extract_strided_slice %197 {offsets = [0, 128], sizes = [8, 128], strides = [1, 1]} : vector<8x256xf32> to vector<8x128xf32>
    %205 = arith.addf %204, %200 : vector<8x128xf32>
    %206 = math.tanh %203 : vector<8x128xf32>
    %207 = vector.broadcast %5 : vector<1x128xf32> to vector<8x128xf32>
    %208 = arith.mulf %207, %206 : vector<8x128xf32>
    %209 = vector.broadcast %6 : vector<1x128xf32> to vector<8x128xf32>
    %210 = arith.addf %208, %209 : vector<8x128xf32>
    %211 = math.tanh %205 : vector<8x128xf32>
    %212 = vector.broadcast %5 : vector<1x128xf32> to vector<8x128xf32>
    %213 = arith.mulf %212, %211 : vector<8x128xf32>
    %214 = vector.broadcast %6 : vector<1x128xf32> to vector<8x128xf32>
    %215 = arith.addf %213, %214 : vector<8x128xf32>
    %216 = vector.extract_strided_slice %210 {offsets = [0, 0], sizes = [8, 32], strides = [1, 1]} : vector<8x128xf32> to vector<8x32xf32>
    %217 = vector.extract_strided_slice %210 {offsets = [0, 32], sizes = [8, 32], strides = [1, 1]} : vector<8x128xf32> to vector<8x32xf32>
    %218 = vector.extract_strided_slice %210 {offsets = [0, 64], sizes = [8, 32], strides = [1, 1]} : vector<8x128xf32> to vector<8x32xf32>
    %219 = vector.extract_strided_slice %210 {offsets = [0, 96], sizes = [8, 32], strides = [1, 1]} : vector<8x128xf32> to vector<8x32xf32>
    %220 = arith.mulf %217, %182 : vector<8x32xf32>
    %221 = arith.mulf %216, %219 : vector<8x32xf32>
    %222 = arith.addf %220, %221 : vector<8x32xf32>
    %223 = math.tanh %222 : vector<8x32xf32>
    %224 = arith.mulf %218, %223 : vector<8x32xf32>
    %225 = vector.extract_strided_slice %215 {offsets = [0, 0], sizes = [8, 32], strides = [1, 1]} : vector<8x128xf32> to vector<8x32xf32>
    %226 = vector.extract_strided_slice %215 {offsets = [0, 32], sizes = [8, 32], strides = [1, 1]} : vector<8x128xf32> to vector<8x32xf32>
    %227 = vector.extract_strided_slice %215 {offsets = [0, 64], sizes = [8, 32], strides = [1, 1]} : vector<8x128xf32> to vector<8x32xf32>
    %228 = vector.extract_strided_slice %215 {offsets = [0, 96], sizes = [8, 32], strides = [1, 1]} : vector<8x128xf32> to vector<8x32xf32>
    %229 = arith.mulf %226, %191 : vector<8x32xf32>
    %230 = arith.mulf %225, %228 : vector<8x32xf32>
    %231 = arith.addf %229, %230 : vector<8x32xf32>
    %232 = math.tanh %231 : vector<8x32xf32>
    %233 = arith.mulf %227, %232 : vector<8x32xf32>
    %c4 = arith.constant 4 : index
    %c0_47 = arith.constant 0 : index
    %c0_48 = arith.constant 0 : index
    %234 = vector.load %arg10[%c4, %c0_47, %c0_48] : memref<8x8x32xf32, #tpu.memory_space<vmem>>, vector<1x8x32xf32>
    %235 = vector.shape_cast %234 : vector<1x8x32xf32> to vector<8x32xf32>
    %236 = vector.shape_cast %233 : vector<8x32xf32> to vector<1x8x32xf32>
    tpu.vector_store %arg10[%c4, %c0_47, %c0_48], %236 {strides = array<i32>} : memref<8x8x32xf32, #tpu.memory_space<vmem>>, vector<1x8x32xf32>,
    %cst_49 = arith.constant dense<0.000000e+00> : vector<8x256xf32>
    %237 = tpu.matmul %224, %1, %cst_49 {dimension_numbers = #tpu.dot_dimension_numbers<[1], [0], [0], [1], [0, 0, 1, 1], [], []>} : vector<8x32xf32>, vector<32x256xf32>, vector<8x256xf32> -> vector<8x256xf32>
    %cst_50 = arith.constant dense<0.000000e+00> : vector<8x128xf32>
    %238 = tpu.matmul %233, %2, %cst_50 {dimension_numbers = #tpu.dot_dimension_numbers<[1], [0], [0], [1], [0, 0, 1, 1], [], []>} : vector<8x32xf32>, vector<32x128xf32>, vector<8x128xf32> -> vector<8x128xf32>
    %239 = vector.broadcast %4 : vector<1x128xf32> to vector<8x128xf32>
    %240 = arith.addf %238, %239 : vector<8x128xf32>
    %241 = vector.extract_strided_slice %237 {offsets = [0, 0], sizes = [8, 128], strides = [1, 1]} : vector<8x256xf32> to vector<8x128xf32>
    %242 = vector.extract_strided_slice %10 {offsets = [48, 0], sizes = [8, 128], strides = [1, 1]} : vector<64x128xf32> to vector<8x128xf32>
    %243 = arith.addf %241, %242 : vector<8x128xf32>
    %244 = vector.extract_strided_slice %237 {offsets = [0, 128], sizes = [8, 128], strides = [1, 1]} : vector<8x256xf32> to vector<8x128xf32>
    %245 = arith.addf %244, %240 : vector<8x128xf32>
    %246 = math.tanh %243 : vector<8x128xf32>
    %247 = vector.broadcast %5 : vector<1x128xf32> to vector<8x128xf32>
    %248 = arith.mulf %247, %246 : vector<8x128xf32>
    %249 = vector.broadcast %6 : vector<1x128xf32> to vector<8x128xf32>
    %250 = arith.addf %248, %249 : vector<8x128xf32>
    %251 = math.tanh %245 : vector<8x128xf32>
    %252 = vector.broadcast %5 : vector<1x128xf32> to vector<8x128xf32>
    %253 = arith.mulf %252, %251 : vector<8x128xf32>
    %254 = vector.broadcast %6 : vector<1x128xf32> to vector<8x128xf32>
    %255 = arith.addf %253, %254 : vector<8x128xf32>
    %256 = vector.extract_strided_slice %250 {offsets = [0, 0], sizes = [8, 32], strides = [1, 1]} : vector<8x128xf32> to vector<8x32xf32>
    %257 = vector.extract_strided_slice %250 {offsets = [0, 32], sizes = [8, 32], strides = [1, 1]} : vector<8x128xf32> to vector<8x32xf32>
    %258 = vector.extract_strided_slice %250 {offsets = [0, 64], sizes = [8, 32], strides = [1, 1]} : vector<8x128xf32> to vector<8x32xf32>
    %259 = vector.extract_strided_slice %250 {offsets = [0, 96], sizes = [8, 32], strides = [1, 1]} : vector<8x128xf32> to vector<8x32xf32>
    %260 = arith.mulf %257, %222 : vector<8x32xf32>
    %261 = arith.mulf %256, %259 : vector<8x32xf32>
    %262 = arith.addf %260, %261 : vector<8x32xf32>
    %263 = math.tanh %262 : vector<8x32xf32>
    %264 = arith.mulf %258, %263 : vector<8x32xf32>
    %265 = vector.extract_strided_slice %255 {offsets = [0, 0], sizes = [8, 32], strides = [1, 1]} : vector<8x128xf32> to vector<8x32xf32>
    %266 = vector.extract_strided_slice %255 {offsets = [0, 32], sizes = [8, 32], strides = [1, 1]} : vector<8x128xf32> to vector<8x32xf32>
    %267 = vector.extract_strided_slice %255 {offsets = [0, 64], sizes = [8, 32], strides = [1, 1]} : vector<8x128xf32> to vector<8x32xf32>
    %268 = vector.extract_strided_slice %255 {offsets = [0, 96], sizes = [8, 32], strides = [1, 1]} : vector<8x128xf32> to vector<8x32xf32>
    %269 = arith.mulf %266, %231 : vector<8x32xf32>
    %270 = arith.mulf %265, %268 : vector<8x32xf32>
    %271 = arith.addf %269, %270 : vector<8x32xf32>
    %272 = math.tanh %271 : vector<8x32xf32>
    %273 = arith.mulf %267, %272 : vector<8x32xf32>
    %c5 = arith.constant 5 : index
    %c0_51 = arith.constant 0 : index
    %c0_52 = arith.constant 0 : index
    %274 = vector.load %arg10[%c5, %c0_51, %c0_52] : memref<8x8x32xf32, #tpu.memory_space<vmem>>, vector<1x8x32xf32>
    %275 = vector.shape_cast %274 : vector<1x8x32xf32> to vector<8x32xf32>
    %276 = vector.shape_cast %273 : vector<8x32xf32> to vector<1x8x32xf32>
    tpu.vector_store %arg10[%c5, %c0_51, %c0_52], %276 {strides = array<i32>} : memref<8x8x32xf32, #tpu.memory_space<vmem>>, vector<1x8x32xf32>,
    %cst_53 = arith.constant dense<0.000000e+00> : vector<8x256xf32>
    %277 = tpu.matmul %264, %1, %cst_53 {dimension_numbers = #tpu.dot_dimension_numbers<[1], [0], [0], [1], [0, 0, 1, 1], [], []>} : vector<8x32xf32>, vector<32x256xf32>, vector<8x256xf32> -> vector<8x256xf32>
    %cst_54 = arith.constant dense<0.000000e+00> : vector<8x128xf32>
    %278 = tpu.matmul %273, %2, %cst_54 {dimension_numbers = #tpu.dot_dimension_numbers<[1], [0], [0], [1], [0, 0, 1, 1], [], []>} : vector<8x32xf32>, vector<32x128xf32>, vector<8x128xf32> -> vector<8x128xf32>
    %279 = vector.broadcast %4 : vector<1x128xf32> to vector<8x128xf32>
    %280 = arith.addf %278, %279 : vector<8x128xf32>
    %281 = vector.extract_strided_slice %277 {offsets = [0, 0], sizes = [8, 128], strides = [1, 1]} : vector<8x256xf32> to vector<8x128xf32>
    %282 = vector.extract_strided_slice %10 {offsets = [56, 0], sizes = [8, 128], strides = [1, 1]} : vector<64x128xf32> to vector<8x128xf32>
    %283 = arith.addf %281, %282 : vector<8x128xf32>
    %284 = vector.extract_strided_slice %277 {offsets = [0, 128], sizes = [8, 128], strides = [1, 1]} : vector<8x256xf32> to vector<8x128xf32>
    %285 = arith.addf %284, %280 : vector<8x128xf32>
    %286 = math.tanh %283 : vector<8x128xf32>
    %287 = vector.broadcast %5 : vector<1x128xf32> to vector<8x128xf32>
    %288 = arith.mulf %287, %286 : vector<8x128xf32>
    %289 = vector.broadcast %6 : vector<1x128xf32> to vector<8x128xf32>
    %290 = arith.addf %288, %289 : vector<8x128xf32>
    %291 = math.tanh %285 : vector<8x128xf32>
    %292 = vector.broadcast %5 : vector<1x128xf32> to vector<8x128xf32>
    %293 = arith.mulf %292, %291 : vector<8x128xf32>
    %294 = vector.broadcast %6 : vector<1x128xf32> to vector<8x128xf32>
    %295 = arith.addf %293, %294 : vector<8x128xf32>
    %296 = vector.extract_strided_slice %290 {offsets = [0, 0], sizes = [8, 32], strides = [1, 1]} : vector<8x128xf32> to vector<8x32xf32>
    %297 = vector.extract_strided_slice %290 {offsets = [0, 32], sizes = [8, 32], strides = [1, 1]} : vector<8x128xf32> to vector<8x32xf32>
    %298 = vector.extract_strided_slice %290 {offsets = [0, 64], sizes = [8, 32], strides = [1, 1]} : vector<8x128xf32> to vector<8x32xf32>
    %299 = vector.extract_strided_slice %290 {offsets = [0, 96], sizes = [8, 32], strides = [1, 1]} : vector<8x128xf32> to vector<8x32xf32>
    %300 = arith.mulf %297, %262 : vector<8x32xf32>
    %301 = arith.mulf %296, %299 : vector<8x32xf32>
    %302 = arith.addf %300, %301 : vector<8x32xf32>
    %303 = math.tanh %302 : vector<8x32xf32>
    %304 = arith.mulf %298, %303 : vector<8x32xf32>
    %305 = vector.extract_strided_slice %295 {offsets = [0, 0], sizes = [8, 32], strides = [1, 1]} : vector<8x128xf32> to vector<8x32xf32>
    %306 = vector.extract_strided_slice %295 {offsets = [0, 32], sizes = [8, 32], strides = [1, 1]} : vector<8x128xf32> to vector<8x32xf32>
    %307 = vector.extract_strided_slice %295 {offsets = [0, 64], sizes = [8, 32], strides = [1, 1]} : vector<8x128xf32> to vector<8x32xf32>
    %308 = vector.extract_strided_slice %295 {offsets = [0, 96], sizes = [8, 32], strides = [1, 1]} : vector<8x128xf32> to vector<8x32xf32>
    %309 = arith.mulf %306, %271 : vector<8x32xf32>
    %310 = arith.mulf %305, %308 : vector<8x32xf32>
    %311 = arith.addf %309, %310 : vector<8x32xf32>
    %312 = math.tanh %311 : vector<8x32xf32>
    %313 = arith.mulf %307, %312 : vector<8x32xf32>
    %c6 = arith.constant 6 : index
    %c0_55 = arith.constant 0 : index
    %c0_56 = arith.constant 0 : index
    %314 = vector.load %arg10[%c6, %c0_55, %c0_56] : memref<8x8x32xf32, #tpu.memory_space<vmem>>, vector<1x8x32xf32>
    %315 = vector.shape_cast %314 : vector<1x8x32xf32> to vector<8x32xf32>
    %316 = vector.shape_cast %313 : vector<8x32xf32> to vector<1x8x32xf32>
    tpu.vector_store %arg10[%c6, %c0_55, %c0_56], %316 {strides = array<i32>} : memref<8x8x32xf32, #tpu.memory_space<vmem>>, vector<1x8x32xf32>,
    %cst_57 = arith.constant dense<0.000000e+00> : vector<8x256xf32>
    %317 = tpu.matmul %304, %1, %cst_57 {dimension_numbers = #tpu.dot_dimension_numbers<[1], [0], [0], [1], [0, 0, 1, 1], [], []>} : vector<8x32xf32>, vector<32x256xf32>, vector<8x256xf32> -> vector<8x256xf32>
    %318 = vector.extract_strided_slice %317 {offsets = [0, 128], sizes = [8, 128], strides = [1, 1]} : vector<8x256xf32> to vector<8x128xf32>
    %cst_58 = arith.constant dense<0.000000e+00> : vector<8x128xf32>
    %319 = tpu.matmul %313, %2, %cst_58 {dimension_numbers = #tpu.dot_dimension_numbers<[1], [0], [0], [1], [0, 0, 1, 1], [], []>} : vector<8x32xf32>, vector<32x128xf32>, vector<8x128xf32> -> vector<8x128xf32>
    %320 = arith.addf %318, %319 : vector<8x128xf32>
    %321 = vector.broadcast %4 : vector<1x128xf32> to vector<8x128xf32>
    %322 = arith.addf %320, %321 : vector<8x128xf32>
    %323 = math.tanh %322 : vector<8x128xf32>
    %324 = vector.broadcast %5 : vector<1x128xf32> to vector<8x128xf32>
    %325 = arith.mulf %324, %323 : vector<8x128xf32>
    %326 = vector.broadcast %6 : vector<1x128xf32> to vector<8x128xf32>
    %327 = arith.addf %325, %326 : vector<8x128xf32>
    %328 = vector.extract_strided_slice %327 {offsets = [0, 0], sizes = [8, 32], strides = [1, 1]} : vector<8x128xf32> to vector<8x32xf32>
    %329 = vector.extract_strided_slice %327 {offsets = [0, 32], sizes = [8, 32], strides = [1, 1]} : vector<8x128xf32> to vector<8x32xf32>
    %330 = vector.extract_strided_slice %327 {offsets = [0, 64], sizes = [8, 32], strides = [1, 1]} : vector<8x128xf32> to vector<8x32xf32>
    %331 = vector.extract_strided_slice %327 {offsets = [0, 96], sizes = [8, 32], strides = [1, 1]} : vector<8x128xf32> to vector<8x32xf32>
    %332 = arith.mulf %329, %311 : vector<8x32xf32>
    %333 = arith.mulf %328, %331 : vector<8x32xf32>
    %334 = arith.addf %332, %333 : vector<8x32xf32>
    %335 = math.tanh %334 : vector<8x32xf32>
    %336 = arith.mulf %330, %335 : vector<8x32xf32>
    %c7 = arith.constant 7 : index
    %c0_59 = arith.constant 0 : index
    %c0_60 = arith.constant 0 : index
    %337 = vector.load %arg10[%c7, %c0_59, %c0_60] : memref<8x8x32xf32, #tpu.memory_space<vmem>>, vector<1x8x32xf32>
    %338 = vector.shape_cast %337 : vector<1x8x32xf32> to vector<8x32xf32>
    %339 = vector.shape_cast %336 : vector<8x32xf32> to vector<1x8x32xf32>
    tpu.vector_store %arg10[%c7, %c0_59, %c0_60], %339 {strides = array<i32>} : memref<8x8x32xf32, #tpu.memory_space<vmem>>, vector<1x8x32xf32>,
    %c0_61 = arith.constant 0 : index
    %c0_62 = arith.constant 0 : index
    %c0_63 = arith.constant 0 : index
    %340 = vector.load %arg11[%c0_61, %c0_62, %c0_63] : memref<2x8x32xf32, #tpu.memory_space<vmem>>, vector<1x8x32xf32>
    %341 = vector.shape_cast %340 : vector<1x8x32xf32> to vector<8x32xf32>
    %342 = vector.shape_cast %304 : vector<8x32xf32> to vector<1x8x32xf32>
    tpu.vector_store %arg11[%c0_61, %c0_62, %c0_63], %342 {strides = array<i32>} : memref<2x8x32xf32, #tpu.memory_space<vmem>>, vector<1x8x32xf32>,
    %c1_64 = arith.constant 1 : index
    %c0_65 = arith.constant 0 : index
    %c0_66 = arith.constant 0 : index
    %343 = vector.load %arg11[%c1_64, %c0_65, %c0_66] : memref<2x8x32xf32, #tpu.memory_space<vmem>>, vector<1x8x32xf32>
    %344 = vector.shape_cast %343 : vector<1x8x32xf32> to vector<8x32xf32>
    %345 = vector.shape_cast %336 : vector<8x32xf32> to vector<1x8x32xf32>
    tpu.vector_store %arg11[%c1_64, %c0_65, %c0_66], %345 {strides = array<i32>} : memref<2x8x32xf32, #tpu.memory_space<vmem>>, vector<1x8x32xf32>,
    %c0_67 = arith.constant 0 : index
    %c0_68 = arith.constant 0 : index
    %c0_69 = arith.constant 0 : index
    %346 = vector.load %arg12[%c0_67, %c0_68, %c0_69] : memref<2x8x32xf32, #tpu.memory_space<vmem>>, vector<1x8x32xf32>
    %347 = vector.shape_cast %346 : vector<1x8x32xf32> to vector<8x32xf32>
    %348 = vector.shape_cast %302 : vector<8x32xf32> to vector<1x8x32xf32>
    tpu.vector_store %arg12[%c0_67, %c0_68, %c0_69], %348 {strides = array<i32>} : memref<2x8x32xf32, #tpu.memory_space<vmem>>, vector<1x8x32xf32>,
    %c1_70 = arith.constant 1 : index
    %c0_71 = arith.constant 0 : index
    %c0_72 = arith.constant 0 : index
    %349 = vector.load %arg12[%c1_70, %c0_71, %c0_72] : memref<2x8x32xf32, #tpu.memory_space<vmem>>, vector<1x8x32xf32>
    %350 = vector.shape_cast %349 : vector<1x8x32xf32> to vector<8x32xf32>
    %351 = vector.shape_cast %334 : vector<8x32xf32> to vector<1x8x32xf32>
    tpu.vector_store %arg12[%c1_70, %c0_71, %c0_72], %351 {strides = array<i32>} : memref<2x8x32xf32, #tpu.memory_space<vmem>>, vector<1x8x32xf32>,
    return
  }
}

</mosaic_0001>

<bundles_post_ra>
// kernel: tpu_custom_call.1
= control target key start
LH: loop header
LB: loop body
LE: loop exit
PB: predicated region body
PF: predicated region fallthrough
CT: control target
= control target key end

     0   :  { %18 = vsyncpa [#allocation3], 0  ;;  %s3067_s0 = inlined_call_operand.vmem [shape: f32[64,16], index: 0, kind: input, shape index: {}]   ;;  %s3068_s1 = inlined_call_operand.vmem [shape: f32[16,128], index: 1, kind: input, shape index: {}]   ;;  %s3069_s2 = inlined_call_operand.vmem [shape: f32[32,256], index: 2, kind: input, shape index: {}]   ;;  %s3070_s3 = inlined_call_operand.hbm [shape: f32[32,128], index: 3, kind: input, shape index: {}]   ;;  %s3071_s4 = inlined_call_operand.hbm [shape: f32[1,128], index: 4, kind: input, shape index: {}]   ;;  %s3072_s5 = inlined_call_operand.hbm [shape: f32[1,128], index: 5, kind: input, shape index: {}]   ;;  %s3073_s6 = inlined_call_operand.hbm [shape: f32[1,128], index: 6, kind: input, shape index: {}]   ;;  %s3074_s7 = inlined_call_operand.hbm [shape: f32[1,128], index: 7, kind: input, shape index: {}]   ;;  %s3075_s8 = inlined_call_operand.hbm [shape: f32[2,8,32], index: 8, kind: input, shape index: {}]   ;;  %s3076_s9 = inlined_call_operand.vmem [shape: f32[2,8,32], index: 9, kind: input, shape index: {}]   ;;  %s3077_s10 = inlined_call_operand.hbm [shape: f32[8,8,32], index: 10, kind: output, shape index: {0}]   ;;  %s3078_s11 = inlined_call_operand.hbm [shape: f32[2,8,32], index: 11, kind: output, shape index: {1}]   ;;  %s3079_s12 = inlined_call_operand.hbm [shape: f32[2,8,32], index: 12, kind: output, shape index: {2}]  }
   0x1   :  { %19 = vsyncpa [#allocation6], 0 }
   0x2   :  { %20 = vsyncpa [#allocation9], 0 }
   0x3   :  { %21 = vsyncpa [#allocation12], 0 }
   0x4   :  { %22 = vsyncpa [#allocation4], 0 }
   0x5   :  { %23 = vsyncpa [#allocation15], 0  ;;  %s2474_s21 = smov [#allocation5]   ;;  %s2475_s23 = smov [#allocation8]  }
   0x6   :  { %s48_s22 = sshll.u32 %s2474_s21, 4  ;;  %s68_s24 = sshll.u32 %s2475_s23, 4  ;;  %s49_s22 = int_to_ptr.vmem [resolvable:$true] %s48_s22  ;;  %s69_s24 = int_to_ptr.vmem [resolvable:$true] %s68_s24 }
   0x7   :  { %s2290_s25 = scalar_lea.vmem %s49_s22, 16  ;;  %s2294_s26 = scalar_lea.vmem %s49_s22, 32 }
   0x8   :  { %p2291_p0 = scmp.ne.s32.totalorder %s49_s22, %s2290_s25  ;;  %p2295_p1 = scmp.lt.s32.totalorder %s49_s22, %s49_s22 }
   0x9   :  { %p2296_p2 = scmp.lt.s32.totalorder %s2294_s26, %s2290_s25 }
   0xb   :  { %p2297_p3 = por %p2296_p2, %p2295_p1 }
   0xd   :  { %p2298_p4 = pnand %p2297_p3, %p2291_p0 }
   0xf   :  { %2301 = shalt.err (!%p2298_p4)
}
  0x10   :  { %51 = dma.hbm_to_vmem [thread:$0]  %s3071_s4, 16, %s49_s22, [#allocation6]  }
  0x11   :  { %s2310_s29 = scalar_lea.vmem %s69_s24, 16  ;;  %s2314_s30 = scalar_lea.vmem %s69_s24, 32 }
  0x12   :  { %p2311_p5 = scmp.ne.s32.totalorder %s69_s24, %s2310_s29  ;;  %p2315_p6 = scmp.lt.s32.totalorder %s69_s24, %s69_s24 }
  0x13   :  { %p2316_p7 = scmp.lt.s32.totalorder %s2314_s30, %s2310_s29 }
  0x15   :  { %p2317_p8 = por %p2316_p7, %p2315_p6 }
  0x17   :  { %p2318_p9 = pnand %p2317_p8, %p2311_p5 }
  0x19   :  { %2321 = shalt.err (!%p2318_p9)
}
  0x1a   :  { %71 = dma.hbm_to_vmem [thread:$0]  %s3073_s6, 16, %s69_s24, [#allocation9]  }
  0x1b   :  { %s2476_s15 = smov [#allocation2]  }
  0x1c   :  { %s35_s16 = sshll.u32 %s2476_s15, 4  ;;  %s36_s16 = int_to_ptr.vmem [resolvable:$true] %s35_s16 }
  0x1d   :  { %s2330_s17 = scalar_lea.vmem %s36_s16, 512  ;;  %p2335_p11 = scmp.lt.s32.totalorder %s36_s16, %s36_s16 }
  0x1e   :  { %p2331_p10 = scmp.ne.s32.totalorder %s36_s16, %s2330_s17  ;;  %p2336_p12 = scmp.lt.s32.totalorder %s2330_s17, %s2330_s17 }
  0x20   :  { %p2337_p13 = por %p2336_p12, %p2335_p11 }
  0x22   :  { %p2338_p0 = pnand %p2337_p13, %p2331_p10 }
  0x24   :  { %2341 = shalt.err (!%p2338_p0)
}
  0x25   :  { %s2477_s4 = smov 128   ;;  %s2478_s18 = smov 8  }
  0x26   :  { %41 = dma.hbm_to_vmem [thread:$0]  %s3070_s3, 512, %s36_s16, [#allocation3], %s2477_s4, %s2477_s4, %s2478_s18  }
  0x27   :  { %s2479_s6 = smov [#allocation7]   ;;  %s2480_s22 = smov [#allocation10]  }
  0x28   :  { %s58_s21 = sshll.u32 %s2479_s6, 4  ;;  %s78_s23 = sshll.u32 %s2480_s22, 4  ;;  %s59_s21 = int_to_ptr.vmem [resolvable:$true] %s58_s21  ;;  %s79_s23 = int_to_ptr.vmem [resolvable:$true] %s78_s23 }
  0x29   :  { %s2350_s24 = scalar_lea.vmem %s59_s21, 16  ;;  %s2354_s25 = scalar_lea.vmem %s59_s21, 32 }
  0x2a   :  { %p2351_p1 = scmp.ne.s32.totalorder %s59_s21, %s2350_s24  ;;  %p2355_p2 = scmp.lt.s32.totalorder %s59_s21, %s59_s21 }
  0x2b   :  { %p2356_p3 = scmp.lt.s32.totalorder %s2354_s25, %s2350_s24 }
  0x2d   :  { %p2357_p4 = por %p2356_p3, %p2355_p2 }
  0x2f   :  { %p2358_p5 = pnand %p2357_p4, %p2351_p1 }
  0x31   :  { %2361 = shalt.err (!%p2358_p5)
}
  0x32   :  { %61 = dma.hbm_to_vmem [thread:$0]  %s3072_s5, 16, %s59_s21, [#allocation6]  }
  0x33   :  { %s2370_s28 = scalar_lea.vmem %s79_s23, 16  ;;  %s2374_s3 = scalar_lea.vmem %s79_s23, 32 }
  0x34   :  { %p2371_p6 = scmp.ne.s32.totalorder %s79_s23, %s2370_s28  ;;  %p2375_p7 = scmp.lt.s32.totalorder %s79_s23, %s79_s23 }
  0x35   :  { %p2376_p8 = scmp.lt.s32.totalorder %s2374_s3, %s2370_s28 }
  0x37   :  { %p2377_p9 = por %p2376_p8, %p2375_p7 }
  0x39   :  { %p2378_p10 = pnand %p2377_p9, %p2371_p6 }
  0x3b   :  { %2381 = shalt.err (!%p2378_p10)
}
  0x3c   :  { %81 = dma.hbm_to_vmem [thread:$0]  %s3074_s7, 16, %s79_s23, [#allocation9]  }
  0x3d   :  { %s2481_s13 = smov [#allocation11]  }
  0x3e   :  { %s87_s14 = sshll.u32 %s2481_s13, 4  ;;  %s88_s14 = int_to_ptr.vmem [resolvable:$true] %s87_s14 }
  0x3f   :  { %s2390_s15 = scalar_lea.vmem %s88_s14, 256  ;;  %p2395_p12 = scmp.lt.s32.totalorder %s88_s14, %s88_s14 }
  0x40   :  { %p2391_p11 = scmp.ne.s32.totalorder %s88_s14, %s2390_s15  ;;  %p2396_p13 = scmp.lt.s32.totalorder %s2390_s15, %s2390_s15 }
  0x42   :  { %p2397_p0 = por %p2396_p13, %p2395_p12 }
  0x44   :  { %p2398_p1 = pnand %p2397_p0, %p2391_p11 }
  0x46   :  { %2401 = shalt.err (!%p2398_p1)
}
  0x47   :  { %93 = dma.hbm_to_vmem [thread:$0]  %s3075_s8, 256, %s88_s14, [#allocation12], %s2477_s4, %s2477_s4, %s2478_s18  }
  0x48   :  { %2462 = dma.done.wait [#allocation3], 512  }
  0x49   :  { %2463 = vsyncadd [#allocation3], 4294966784 }
  0x4a   :  { %2464 = dma.done.wait [#allocation6], 32  }
  0x4b   :  { %2465 = vsyncadd [#allocation6], 4294967264 }
  0x4c   :  { %2466 = dma.done.wait [#allocation9], 32  }
  0x4d   :  { %2467 = vsyncadd [#allocation9], 4294967264 }
  0x4e   :  { %2468 = dma.done.wait [#allocation12], 256  }
  0x4f   :  { %2469 = vsyncadd [#allocation12], 4294967040  ;;  %v2482_v0 = vmov 0.0   ;;  %v115_v1 = vld [vmem:[%s3068_s1 + $0x8] sm:$0xff]  ;;  %v2586_v2 = vld [vmem:[%s3069_s2 + $0x38] sm:$0xff]  ;;  %vm146_vm0 = vcmask 130048  }
  0x50   :  { %350 = vmatprep.mubr.f32.mxu1 %v2482_v0  ;;  %v2591_v3 = vld [vmem:[%s3069_s2 + $0x30] sm:$0xff]  ;;  %2096 = vmatprep.subr.mxu0 %v115_v1  ;;  %v114_v4 = vld [vmem:[%s3068_s1] sm:$0xff]  ;;  %v2600_v5 = vld [vmem:[%s3069_s2 + $0x28] sm:$0xff]  ;;  %vm282_vm1 = vcmask 261120   ;;  %vm2484_vm2 = vmmov 0   ;;  %s2487_s30 = smov [#allocation14]  }
  0x51   :  { %310 = vmatprep.subr.mxu1 %v2586_v2  ;;  %v132_v6 = vld [vmem:[%s3067_s0] sm:$0xff]  ;;  %2097 = vmatpush3.msra.mxu0 %v115_v1  ;;  %v133_v8 = vld [vmem:[%s3067_s0 + $0x8] sm:$0xff]  ;;  %v2618_v9 = vld [vmem:[%s3069_s2 + $0x18] sm:$0xff]  ;;  %s1982_s13 = sshll.u32 %s2487_s30, 4  ;;  %s2488_s14 = smov [#allocation13]   ;;  %s1983_s13 = int_to_ptr.vmem [resolvable:$true] %s1982_s13 }
  0x52   :  { %311 = vmatpush1.msra.mxu1 %v2591_v3  ;;  %v2609_v7 = vld [vmem:[%s3069_s2 + $0x20] sm:$0xff]  ;;  %2098 = vmatprep.subr.mxu0 %v114_v4  ;;  %v2624_v10 = vld [vmem:[%s3069_s2 + $0x10] sm:$0xff]  ;;  %v2631_v11 = vld [vmem:[%s3069_s2 + $0x8] sm:$0xff]  ;;  %s1970_s15 = sshll.u32 %s2488_s14, 4  ;;  %s2489_s5 = smov [#allocation16]   ;;  %s1971_s15 = int_to_ptr.vmem [resolvable:$true] %s1970_s15 }
  0x53   :  { %312 = vmatprep.subr.mxu1 %v2600_v5  ;;  %2099 = vmatpush3.msra.mxu0 %v114_v4  ;;  %v2637_v12 = vld [vmem:[%s3069_s2] sm:$0xff]  ;;  %v276_v13 = vld [vmem:[#allocation11] sm:$0xff]  ;;  %s2483_s2 = smov 32   ;;  %v2674_v33 = vld [vmem:[#allocation2 + $0x18] sm:$0xff]  ;;  %s1994_s16 = sshll.u32 %s2489_s5, 4  ;;  %s3041_s16 = int_to_ptr.vmem [resolvable:$true] %s1994_s16 }
  0x54   :  { %2100 = vmatprep.mubr.msk.f32.mxu0 %vm146_vm0, %v132_v6  ;;  %313 = vmatpush1.msra.mxu1 %v2609_v7  ;;  %v2656_v15 = vld [vmem:[#allocation5] ss:$0 sm:$0xff]  ;;  %v2659_v21 = vld [vmem:[#allocation8] ss:$0 sm:$0xff]  ;;  %v2661_v23 = vld [vmem:[#allocation10] ss:$0 sm:$0xff]  ;;  %p2407_p3 = scmp.lt.s32.totalorder %s1983_s13, %s1983_s13 }
  0x55   :  { %2101 = vmatmul.mubr.msk.f32.vlgmr.msra.gmra.mxu0 %vm146_vm0, %v133_v8  ;;  %314 = vmatprep.subr.mxu1 %v2618_v9  ;;  %v277_v26 = vld [vmem:[%s3076_s9] sm:$0xff]  ;;  %v134_v34 = vld [vmem:[%s3067_s0 + $0x10] sm:$0xff]  ;;  %v135_v35 = vld [vmem:[%s3067_s0 + $0x18] sm:$0xff]  ;;  %s2402_s7 = scalar_lea.vmem %s1983_s13, 256 }
  0x56   :  { %2112 = vmatprep.subr.mxu0 %v2482_v0  ;;  %315 = vmatpush1.msra.mxu1 %v2624_v10  ;;  %v2684_v36 = vld [vmem:[#allocation2 + $0x10] sm:$0xff]  ;;  %v136_v37 = vld [vmem:[%s3067_s0 + $0x20] sm:$0xff]  ;;  %v2691_v38 = vld [vmem:[#allocation2 + $0x8] sm:$0xff]  ;;  %p2403_p2 = scmp.ne.s32.totalorder %s1983_s13, %s2402_s7  ;;  %p2408_p4 = scmp.lt.s32.totalorder %s2402_s7, %s2402_s7 }
  0x57   :  { %316 = vmatprep.subr.mxu1 %v2631_v11  ;;  %2113 = vmatpush3.msra.mxu0 %v2674_v33  ;;  %v137_v39 = vld [vmem:[%s3067_s0 + $0x28] sm:$0xff]  ;;  %v138_v40 = vld [vmem:[%s3067_s0 + $0x30] sm:$0xff]  ;;  %v2702_v41 = vld [vmem:[#allocation2] sm:$0xff] }
  0x58   :  { %317 = vmatpush1.msra.mxu1 %v2637_v12  ;;  %2103 = vmatprep.mubr.msk.f32.mxu0 %vm146_vm0, %v134_v34  ;;  %v139_v42 = vld [vmem:[%s3067_s0 + $0x38] sm:$0xff]  ;;  %v279_v44 = vld [vmem:[#allocation11 + $0x8] sm:$0xff]  ;;  %s2485_s0 = smov 64   ;;  %v2751_v56 = vld [vmem:[#allocation7] ss:$0 sm:$0xff]  ;;  %p2409_p5 = por %p2408_p4, %p2407_p3 }
  0x59   :  { %2026 = vmatmul.mubr.msk.f32.vlgmr.msra.gmra.mxu1 %vm282_vm1, %v276_v13  ;;  %422 = vmatprep.subr.mxu1 %v2586_v2 }
  0x5a   :  { %423 = vmatpush1.msra.mxu1 %v2591_v3  ;;  %462 = vmatprep.mubr.f32.mxu1 %v2482_v0  ;;  %p2410_p6 = pnand %p2409_p5, %p2403_p2 }
  0x5b   :  { %424 = vmatprep.subr.mxu1 %v2600_v5  ;;  %2104 = vmatmul.mubr.msk.f32.gmra.mxu0 %vm146_vm0, %v135_v35 }
  0x5c   :  { %425 = vmatpush1.msra.mxu1 %v2609_v7  ;;  %2114 = vmatprep.subr.mxu0 %v2482_v0 }
  0x5d   :  { %426 = vmatprep.subr.mxu1 %v2618_v9  ;;  %2115 = vmatpush3.msra.mxu0 %v2684_v36 }
  0x5e   :  { %427 = vmatpush1.msra.mxu1 %v2624_v10  ;;  %2106 = vmatprep.mubr.msk.f32.mxu0 %vm146_vm0, %v136_v37 }
  0x5f   :  { %428 = vmatprep.subr.mxu1 %v2631_v11  ;;  %2116 = vmatprep.subr.mxu0 %v2482_v0 }
  0x60   :  { %429 = vmatpush1.msra.mxu1 %v2637_v12  ;;  %2117 = vmatpush3.msra.mxu0 %v2691_v38 }
  0x61   :  { %628 = vmatprep.subr.mxu1 %v2586_v2  ;;  %2107 = vmatmul.mubr.msk.f32.gmra.mxu0 %vm146_vm0, %v137_v39 }
  0x62   :  { %2118 = vmatprep.subr.mxu0 %v2482_v0  ;;  %2109 = vmatprep.mubr.msk.f32.mxu0 %vm146_vm0, %v138_v40 }
  0x63   :  { %2119 = vmatpush3.msra.mxu0 %v2702_v41 }
  0x64   :  { %2123 = vmatprep.subr.mxu0 %v2482_v0 }
  0x65   :  { %2110 = vmatmul.mubr.msk.f32.gmra.mxu0 %vm146_vm0, %v139_v42 }
  0x66   :  { %2120 = vmatprep.mubr.msk.f32.mxu0 %vm2484_vm2, %v2482_v0 }
  0x69   :  { %2121 = vmatmul.mubr.msk.f32.vlgmr.msra.gmra.mxu0 %vm282_vm1, %v279_v44 }
  0x6a   :  { %2124 = vmatpush3.msra.mxu0 %v2674_v33  ;;  %2131 = vmatprep.mubr.msk.f32.mxu0 %vm2484_vm2, %v2482_v0 }
  0x6b   :  { %2125 = vmatprep.subr.mxu0 %v2482_v0 }
  0x6c   :  { %2126 = vmatpush3.msra.mxu0 %v2684_v36 }
  0x6d   :  { %2127 = vmatprep.subr.mxu0 %v2482_v0 }
  0x6e   :  { %2128 = vmatpush3.msra.mxu0 %v2691_v38 }
  0x6f   :  { %2129 = vmatprep.subr.mxu0 %v2482_v0 }
  0x70   :  { %2130 = vmatpush3.msra.mxu0 %v2702_v41 }
  0x71   :  { %2134 = vmatprep.subr.mxu0 %v2482_v0 }
 0x115   :  { %v2654_v14 = vpop.f32.mrf.mxu0 }
 0x116   :  { %v243_v57 = vadd.f32 %v2654_v14, %v2656_v15  ;;  %v2025_v14 = vld [vmem:[%s3076_s9 + $0x8] sm:$0xff]  ;;  %s2486_s9 = smov 96  }
 0x117   :  { %v237_v16 = vpop.f32.mrf.mxu0 }
 0x118   :  { %v238_v17 = vadd.f32 %v2656_v15, %v237_v16 }
 0x119   :  { %v352_v18 = vpop.f32.mrf.mxu1 }
 0x11a   :  { %v356_v19 = vadd.f32 %v352_v18, %v238_v17 }
 0x11b   :  { %v354_v20 = vpop.f32.mrf.mxu1  ;;  %v2729_v47 = vpop.f32.mrf.mxu0 }
 0x11c   :  { %2216 = vtanh.f32 %v356_v19 }
 0x11d   :  { %v2731_v48 = vpop.f32.mrf.mxu0 }
 0x11e   :  { %v248_v40 = vadd.f32 %v2656_v15, %v2731_v48 }
 0x121   :  { %v2733_v49 = vpop.f32.mrf.mxu0 }
 0x123   :  { %v2735_v50 = vpop.f32.mrf.mxu0 }
 0x125   :  { %v2737_v51 = vpop.f32.mrf.mxu0 }
 0x127   :  { %v2739_v52 = vpop.f32.mrf.mxu0 }
 0x129   :  { %v2217_v22 = vpop.eup %2216  ;;  %v544_v53 = vpop.f32.mrf.mxu0 }
 0x12a   :  { %v364_v24 = vmul.f32 %v2217_v22, %v2659_v21  ;;  %v545_v58 = vadd.f32 %v2751_v56, %v544_v53 }
 0x12b   :  { %v2122_v54 = vpop.f32.mrf.mxu0 }
 0x12c   :  { %v371_v25 = vadd.f32 %v2661_v23, %v364_v24 }
 0x12e   :  { %378 = vrot.lane.b32.xlu0 %v371_v25, %s2483_s2 }
 0x132   :  { %373 = vrot.lane.b32.xlu0 %v277_v26, %s2483_s2 }
 0x1a0   :  { %v379_v27 = vpop.permute.xlu0 %378 }
 0x1a1   :  { %v381_v28 = vmul.f32 %v379_v27, %v371_v25 }
 0x1a3   :  { %383 = vrot.lane.b32.xlu1 %v381_v28, %s2483_s2 }
 0x1a4   :  { %v374_v29 = vpop.permute.xlu0 %373 }
 0x1a5   :  { %v376_v30 = vmul.f32 %v374_v29, %v371_v25 }
 0x215   :  { %v384_v31 = vpop.permute.xlu1 %383 }
 0x216   :  { %v2671_v32 = vadd.f32 %v384_v31, %v376_v30 }
 0x218   :  { %2218 = vtanh.f32 %v2671_v32 }
 0x225   :  { %v2219_v43 = vpop.eup %2218 }
 0x226   :  { %389 = vrot.lane.b32.xlu1 %v2219_v43, %s2483_s2 }
 0x298   :  { %v390_v45 = vpop.permute.xlu1 %389 }
 0x299   :  { %v392_v46 = vmul.f32 %v390_v45, %v371_v25 }
 0x29b   :  { %394 = vrot.lane.b32.xlu0 %v392_v46, %s2485_s0 }
 0x30d   :  { %v395_v55 = vpop.permute.xlu0 %394 }
 0x30e   :  { %2029 = vmatmul.mubr.msk.f32.vlgmr.msra.gmra.mxu1 %vm282_vm1, %v395_v55 }
 0x30f   :  { %629 = vmatpush1.msra.mxu1 %v2591_v3  ;;  %668 = vmatprep.mubr.f32.mxu1 %v2482_v0 }
 0x310   :  { %630 = vmatprep.subr.mxu1 %v2600_v5 }
 0x311   :  { %631 = vmatpush1.msra.mxu1 %v2609_v7 }
 0x312   :  { %632 = vmatprep.subr.mxu1 %v2618_v9 }
 0x313   :  { %633 = vmatpush1.msra.mxu1 %v2624_v10 }
 0x314   :  { %634 = vmatprep.subr.mxu1 %v2631_v11 }
 0x315   :  { %635 = vmatpush1.msra.mxu1 %v2637_v12 }
 0x316   :  { %824 = vmatprep.subr.mxu1 %v2586_v2 }
 0x3ce   :  { %v464_v59 = vpop.f32.mrf.mxu1 }
 0x3cf   :  { %v548_v60 = vadd.f32 %v464_v59, %v243_v57 }
 0x3d0   :  { %v466_v61 = vpop.f32.mrf.mxu1 }
 0x3d1   :  { %2220 = vtanh.f32 %v548_v60  ;;  %v549_v62 = vadd.f32 %v545_v58, %v466_v61 }
 0x3d3   :  { %2222 = vtanh.f32 %v549_v62 }
 0x3de   :  { %v2221_v63 = vpop.eup %2220 }
 0x3df   :  { %v551_v1 = vmul.f32 %v2221_v63, %v2659_v21 }
 0x3e0   :  { %v2223_v4 = vpop.eup %2222 }
 0x3e1   :  { %v552_v6 = vadd.f32 %v2661_v23, %v551_v1  ;;  %v554_v8 = vmul.f32 %v2223_v4, %v2659_v21 }
 0x3e3   :  { %558 = vrot.lane.b32.xlu1 %v552_v6, %s2483_s2  ;;  %v555_v13 = vadd.f32 %v2661_v23, %v554_v8  ;;  %v556_v22 = vmul.f32 %v552_v6, %v2671_v32 }
 0x3e5   :  { %579 = vrot.lane.b32.xlu0 %v555_v13, %s2483_s2 }
 0x3e7   :  { %574 = vrot.lane.b32.xlu1 %v2025_v14, %s2483_s2 }
 0x455   :  { %v559_v16 = vpop.permute.xlu1 %558 }
 0x456   :  { %v561_v17 = vmul.f32 %v559_v16, %v552_v6 }
 0x457   :  { %v580_v18 = vpop.permute.xlu0 %579 }
 0x458   :  { %v582_v19 = vmul.f32 %v580_v18, %v555_v13  ;;  %563 = vrot.lane.b32.xlu0 %v561_v17, %s2483_s2 }
 0x459   :  { %v575_v20 = vpop.permute.xlu1 %574 }
 0x45a   :  { %584 = vrot.lane.b32.xlu1 %v582_v19, %s2483_s2  ;;  %v577_v25 = vmul.f32 %v575_v20, %v555_v13 }
 0x4ca   :  { %v564_v24 = vpop.permute.xlu0 %563 }
 0x4cb   :  { %v566_v26 = vadd.f32 %v564_v24, %v556_v22 }
 0x4cc   :  { %v585_v27 = vpop.permute.xlu1 %584 }
 0x4cd   :  { %2224 = vtanh.f32 %v566_v26  ;;  %v2769_v28 = vadd.f32 %v585_v27, %v577_v25  ;;  %v253_v27 = vadd.f32 %v2729_v47, %v2656_v15 }
 0x4cf   :  { %2226 = vtanh.f32 %v2769_v28 }
 0x4da   :  { %v2225_v29 = vpop.eup %2224 }
 0x4db   :  { %569 = vrot.lane.b32.xlu0 %v2225_v29, %s2483_s2 }
 0x4dc   :  { %v2227_v30 = vpop.eup %2226 }
 0x4dd   :  { %590 = vrot.lane.b32.xlu1 %v2227_v30, %s2483_s2 }
 0x54d   :  { %v570_v31 = vpop.permute.xlu0 %569 }
 0x54e   :  { %v572_v34 = vmul.f32 %v570_v31, %v552_v6 }
 0x54f   :  { %v591_v35 = vpop.permute.xlu1 %590 }
 0x550   :  { %v593_v37 = vmul.f32 %v591_v35, %v555_v13  ;;  %600 = vrot.lane.b32.xlu1 %v572_v34, %s2485_s0 }
 0x552   :  { %595 = vrot.lane.b32.xlu0 %v593_v37, %s2485_s0 }
 0x5c2   :  { %v601_v32 = vpop.permute.xlu1 %600 }
 0x5c3   :  { %2032 = vmatmul.mubr.msk.f32.vlgmr.msra.gmra.mxu1 %vm282_vm1, %v601_v32 }
 0x5c4   :  { %v596_v39 = vpop.permute.xlu0 %595  ;;  %825 = vmatpush1.msra.mxu1 %v2591_v3  ;;  %864 = vmatprep.mubr.f32.mxu1 %v2482_v0 }
 0x5c5   :  { %598 = vst.msk [vmem:[#allocation13] sm:$0xff] %vm282_vm1, %v596_v39  ;;  %2132 = vmatmul.mubr.msk.f32.vlgmr.msra.gmra.mxu0 %vm282_vm1, %v596_v39  ;;  %826 = vmatprep.subr.mxu1 %v2600_v5 }
 0x5c6   :  { %827 = vmatpush1.msra.mxu1 %v2609_v7  ;;  %2135 = vmatpush3.msra.mxu0 %v2674_v33 }
 0x5c7   :  { %828 = vmatprep.subr.mxu1 %v2618_v9  ;;  %2136 = vmatprep.subr.mxu0 %v2482_v0 }
 0x5c8   :  { %829 = vmatpush1.msra.mxu1 %v2624_v10  ;;  %2137 = vmatpush3.msra.mxu0 %v2684_v36 }
 0x5c9   :  { %830 = vmatprep.subr.mxu1 %v2631_v11  ;;  %2138 = vmatprep.subr.mxu0 %v2482_v0 }
 0x5ca   :  { %831 = vmatpush1.msra.mxu1 %v2637_v12  ;;  %2139 = vmatpush3.msra.mxu0 %v2691_v38 }
 0x5cb   :  { %2140 = vmatprep.subr.mxu0 %v2482_v0  ;;  %2142 = vmatprep.mubr.msk.f32.mxu0 %vm2484_vm2, %v2482_v0 }
 0x5cc   :  { %2141 = vmatpush3.msra.mxu0 %v2702_v41  ;;  %1020 = vmatprep.subr.mxu1 %v2586_v2 }
 0x5cd   :  { %2145 = vmatprep.subr.mxu0 %v2482_v0 }
 0x683   :  { %v670_v42 = vpop.f32.mrf.mxu1 }
 0x684   :  { %v747_v43 = vadd.f32 %v670_v42, %v248_v40 }
 0x685   :  { %v743_v44 = vpop.f32.mrf.mxu0  ;;  %v672_v46 = vpop.f32.mrf.mxu1 }
 0x686   :  { %2228 = vtanh.f32 %v747_v43  ;;  %v744_v45 = vadd.f32 %v2751_v56, %v743_v44 }
 0x687   :  { %v2133_v53 = vpop.f32.mrf.mxu0 }
 0x688   :  { %v748_v54 = vadd.f32 %v744_v45, %v672_v46 }
 0x68a   :  { %2230 = vtanh.f32 %v748_v54 }
 0x693   :  { %v2229_v55 = vpop.eup %2228 }
 0x694   :  { %v750_v57 = vmul.f32 %v2229_v55, %v2659_v21 }
 0x696   :  { %v751_v58 = vadd.f32 %v2661_v23, %v750_v57 }
 0x697   :  { %v2231_v59 = vpop.eup %2230 }
 0x698   :  { %757 = vrot.lane.b32.xlu0 %v751_v58, %s2483_s2  ;;  %v753_v48 = vmul.f32 %v2231_v59, %v2659_v21  ;;  %v755_v4 = vmul.f32 %v751_v58, %v566_v26 }
 0x69a   :  { %v754_v60 = vadd.f32 %v2661_v23, %v753_v48 }
 0x69c   :  { %774 = vrot.lane.b32.xlu1 %v754_v60, %s2483_s2  ;;  %v772_v13 = vmul.f32 %v754_v60, %v2769_v28 }
 0x70a   :  { %v758_v61 = vpop.permute.xlu0 %757 }
 0x70b   :  { %v760_v62 = vmul.f32 %v758_v61, %v751_v58 }
 0x70d   :  { %762 = vrot.lane.b32.xlu0 %v760_v62, %s2483_s2 }
 0x70e   :  { %v775_v63 = vpop.permute.xlu1 %774 }
 0x70f   :  { %v777_v1 = vmul.f32 %v775_v63, %v754_v60 }
 0x711   :  { %779 = vrot.lane.b32.xlu1 %v777_v1, %s2483_s2 }
 0x77f   :  { %v763_v6 = vpop.permute.xlu0 %762 }
 0x780   :  { %v2809_v8 = vadd.f32 %v763_v6, %v755_v4 }
 0x782   :  { %2232 = vtanh.f32 %v2809_v8 }
 0x783   :  { %v780_v14 = vpop.permute.xlu1 %779 }
 0x784   :  { %v2813_v16 = vadd.f32 %v780_v14, %v772_v13  ;;  %v258_v13 = vadd.f32 %v2656_v15, %v2735_v50 }
 0x786   :  { %2234 = vtanh.f32 %v2813_v16 }
 0x78f   :  { %v2233_v17 = vpop.eup %2232 }
 0x790   :  { %768 = vrot.lane.b32.xlu0 %v2233_v17, %s2483_s2 }
 0x793   :  { %v2235_v18 = vpop.eup %2234 }
 0x794   :  { %785 = vrot.lane.b32.xlu1 %v2235_v18, %s2483_s2 }
 0x802   :  { %v769_v19 = vpop.permute.xlu0 %768 }
 0x803   :  { %v771_v20 = vmul.f32 %v769_v19, %v751_v58 }
 0x805   :  { %796 = vrot.lane.b32.xlu1 %v771_v20, %s2485_s0 }
 0x806   :  { %v786_v22 = vpop.permute.xlu1 %785 }
 0x807   :  { %v788_v24 = vmul.f32 %v786_v22, %v754_v60 }
 0x809   :  { %790 = vrot.lane.b32.xlu0 %v788_v24, %s2485_s0 }
 0x877   :  { %v797_v25 = vpop.permute.xlu1 %796 }
 0x878   :  { %2034 = vmatmul.mubr.msk.f32.vlgmr.msra.gmra.mxu1 %vm282_vm1, %v797_v25 }
 0x879   :  { %1021 = vmatpush1.msra.mxu1 %v2591_v3  ;;  %1060 = vmatprep.mubr.f32.mxu1 %v2482_v0 }
 0x87a   :  { %1022 = vmatprep.subr.mxu1 %v2600_v5 }
 0x87b   :  { %v791_v26 = vpop.permute.xlu0 %790  ;;  %1023 = vmatpush1.msra.mxu1 %v2609_v7 }
 0x87c   :  { %794 = vst.msk [vmem:[#allocation13 + $0x8] sm:$0xff] %vm282_vm1, %v791_v26  ;;  %2143 = vmatmul.mubr.msk.f32.vlgmr.msra.gmra.mxu0 %vm282_vm1, %v791_v26  ;;  %1024 = vmatprep.subr.mxu1 %v2618_v9 }
 0x87d   :  { %1025 = vmatpush1.msra.mxu1 %v2624_v10  ;;  %2146 = vmatpush3.msra.mxu0 %v2674_v33 }
 0x87e   :  { %1026 = vmatprep.subr.mxu1 %v2631_v11  ;;  %2147 = vmatprep.subr.mxu0 %v2482_v0 }
 0x87f   :  { %1027 = vmatpush1.msra.mxu1 %v2637_v12  ;;  %2148 = vmatpush3.msra.mxu0 %v2684_v36 }
 0x880   :  { %2149 = vmatprep.subr.mxu0 %v2482_v0  ;;  %2153 = vmatprep.mubr.msk.f32.mxu0 %vm2484_vm2, %v2482_v0 }
 0x881   :  { %2150 = vmatpush3.msra.mxu0 %v2691_v38  ;;  %1216 = vmatprep.subr.mxu1 %v2586_v2 }
 0x882   :  { %2151 = vmatprep.subr.mxu0 %v2482_v0 }
 0x883   :  { %2152 = vmatpush3.msra.mxu0 %v2702_v41 }
 0x884   :  { %2156 = vmatprep.subr.mxu0 %v2482_v0 }
 0x938   :  { %v866_v28 = vpop.f32.mrf.mxu1 }
 0x939   :  { %v943_v29 = vadd.f32 %v866_v28, %v253_v27 }
 0x93a   :  { %v868_v34 = vpop.f32.mrf.mxu1 }
 0x93b   :  { %2236 = vtanh.f32 %v943_v29 }
 0x93c   :  { %v939_v30 = vpop.f32.mrf.mxu0 }
 0x93d   :  { %v940_v31 = vadd.f32 %v2751_v56, %v939_v30 }
 0x93e   :  { %v2144_v35 = vpop.f32.mrf.mxu0 }
 0x93f   :  { %v944_v37 = vadd.f32 %v940_v31, %v868_v34 }
 0x941   :  { %2238 = vtanh.f32 %v944_v37 }
 0x948   :  { %v2237_v32 = vpop.eup %2236 }
 0x949   :  { %v946_v39 = vmul.f32 %v2237_v32, %v2659_v21 }
 0x94b   :  { %v947_v40 = vadd.f32 %v2661_v23, %v946_v39 }
 0x94d   :  { %953 = vrot.lane.b32.xlu0 %v947_v40, %s2483_s2  ;;  %v951_v54 = vmul.f32 %v947_v40, %v2809_v8 }
 0x94e   :  { %v2239_v42 = vpop.eup %2238 }
 0x94f   :  { %v949_v47 = vmul.f32 %v2239_v42, %v2659_v21 }
 0x951   :  { %v950_v43 = vadd.f32 %v2661_v23, %v949_v47 }
 0x953   :  { %970 = vrot.lane.b32.xlu1 %v950_v43, %s2483_s2  ;;  %v968_v58 = vmul.f32 %v950_v43, %v2813_v16 }
 0x9bf   :  { %v954_v44 = vpop.permute.xlu0 %953 }
 0x9c0   :  { %v956_v45 = vmul.f32 %v954_v44, %v947_v40 }
 0x9c2   :  { %958 = vrot.lane.b32.xlu0 %v956_v45, %s2483_s2 }
 0x9c5   :  { %v971_v46 = vpop.permute.xlu1 %970 }
 0x9c6   :  { %v973_v53 = vmul.f32 %v971_v46, %v950_v43 }
 0x9c8   :  { %975 = vrot.lane.b32.xlu1 %v973_v53, %s2483_s2 }
 0xa34   :  { %v959_v55 = vpop.permute.xlu0 %958 }
 0xa35   :  { %v2854_v57 = vadd.f32 %v959_v55, %v951_v54 }
 0xa37   :  { %2240 = vtanh.f32 %v2854_v57 }
 0xa3a   :  { %v976_v59 = vpop.permute.xlu1 %975 }
 0xa3b   :  { %v2858_v48 = vadd.f32 %v976_v59, %v968_v58 }
 0xa3d   :  { %2242 = vtanh.f32 %v2858_v48 }
 0xa44   :  { %v2241_v60 = vpop.eup %2240 }
 0xa45   :  { %964 = vrot.lane.b32.xlu0 %v2241_v60, %s2483_s2 }
 0xa4a   :  { %v2243_v61 = vpop.eup %2242 }
 0xa4b   :  { %981 = vrot.lane.b32.xlu1 %v2243_v61, %s2483_s2 }
 0xab7   :  { %v965_v62 = vpop.permute.xlu0 %964 }
 0xab8   :  { %v967_v63 = vmul.f32 %v965_v62, %v947_v40 }
 0xaba   :  { %992 = vrot.lane.b32.xlu1 %v967_v63, %s2485_s0 }
 0xabd   :  { %v982_v1 = vpop.permute.xlu1 %981 }
 0xabe   :  { %v984_v4 = vmul.f32 %v982_v1, %v950_v43 }
 0xac0   :  { %986 = vrot.lane.b32.xlu0 %v984_v4, %s2485_s0 }
 0xb2c   :  { %v993_v6 = vpop.permute.xlu1 %992 }
 0xb2d   :  { %2036 = vmatmul.mubr.msk.f32.vlgmr.msra.gmra.mxu1 %vm282_vm1, %v993_v6 }
 0xb2e   :  { %1217 = vmatpush1.msra.mxu1 %v2591_v3  ;;  %1256 = vmatprep.mubr.f32.mxu1 %v2482_v0 }
 0xb2f   :  { %1218 = vmatprep.subr.mxu1 %v2600_v5 }
 0xb30   :  { %1219 = vmatpush1.msra.mxu1 %v2609_v7 }
 0xb31   :  { %1220 = vmatprep.subr.mxu1 %v2618_v9 }
 0xb32   :  { %v987_v8 = vpop.permute.xlu0 %986  ;;  %1221 = vmatpush1.msra.mxu1 %v2624_v10 }
 0xb33   :  { %990 = vst.msk [vmem:[#allocation13 + $0x10] sm:$0xff] %vm282_vm1, %v987_v8  ;;  %2154 = vmatmul.mubr.msk.f32.vlgmr.msra.gmra.mxu0 %vm282_vm1, %v987_v8  ;;  %1222 = vmatprep.subr.mxu1 %v2631_v11 }
 0xb34   :  { %1223 = vmatpush1.msra.mxu1 %v2637_v12  ;;  %2157 = vmatpush3.msra.mxu0 %v2674_v33 }
 0xb35   :  { %2158 = vmatprep.subr.mxu0 %v2482_v0  ;;  %2164 = vmatprep.mubr.msk.f32.mxu0 %vm2484_vm2, %v2482_v0 }
 0xb36   :  { %2159 = vmatpush3.msra.mxu0 %v2684_v36  ;;  %1412 = vmatprep.subr.mxu1 %v2586_v2 }
 0xb37   :  { %2160 = vmatprep.subr.mxu0 %v2482_v0 }
 0xb38   :  { %2161 = vmatpush3.msra.mxu0 %v2691_v38 }
 0xb39   :  { %2162 = vmatprep.subr.mxu0 %v2482_v0 }
 0xb3a   :  { %2163 = vmatpush3.msra.mxu0 %v2702_v41 }
 0xb3b   :  { %2167 = vmatprep.subr.mxu0 %v2482_v0 }
 0xbed   :  { %v1062_v14 = vpop.f32.mrf.mxu1 }
 0xbee   :  { %v1139_v16 = vadd.f32 %v1062_v14, %v258_v13 }
 0xbef   :  { %v1064_v19 = vpop.f32.mrf.mxu1 }
 0xbf0   :  { %2244 = vtanh.f32 %v1139_v16 }
 0xbf3   :  { %v1135_v17 = vpop.f32.mrf.mxu0 }
 0xbf4   :  { %v1136_v18 = vadd.f32 %v2751_v56, %v1135_v17 }
 0xbf5   :  { %v2155_v20 = vpop.f32.mrf.mxu0 }
 0xbf6   :  { %v1140_v22 = vadd.f32 %v1136_v18, %v1064_v19 }
 0xbf8   :  { %2246 = vtanh.f32 %v1140_v22 }
 0xbfd   :  { %v2245_v24 = vpop.eup %2244 }
 0xbfe   :  { %v1142_v25 = vmul.f32 %v2245_v24, %v2659_v21 }
 0xc00   :  { %v1143_v26 = vadd.f32 %v2661_v23, %v1142_v25 }
 0xc02   :  { %1149 = vrot.lane.b32.xlu0 %v1143_v26, %s2483_s2  ;;  %v1147_v35 = vmul.f32 %v1143_v26, %v2854_v57  ;;  %v263_v57 = vadd.f32 %v2733_v49, %v2656_v15 }
 0xc05   :  { %v2247_v27 = vpop.eup %2246 }
 0xc06   :  { %v1145_v50 = vmul.f32 %v2247_v27, %v2659_v21 }
 0xc08   :  { %v1146_v28 = vadd.f32 %v2661_v23, %v1145_v50 }
 0xc0a   :  { %1166 = vrot.lane.b32.xlu1 %v1146_v28, %s2483_s2  ;;  %v1164_v39 = vmul.f32 %v1146_v28, %v2858_v48 }
 0xc74   :  { %v1150_v29 = vpop.permute.xlu0 %1149 }
 0xc75   :  { %v1152_v30 = vmul.f32 %v1150_v29, %v1143_v26 }
 0xc77   :  { %1154 = vrot.lane.b32.xlu0 %v1152_v30, %s2483_s2 }
 0xc7c   :  { %v1167_v31 = vpop.permute.xlu1 %1166 }
 0xc7d   :  { %v1169_v34 = vmul.f32 %v1167_v31, %v1146_v28 }
 0xc7f   :  { %1171 = vrot.lane.b32.xlu1 %v1169_v34, %s2483_s2 }
 0xce9   :  { %v1155_v37 = vpop.permute.xlu0 %1154 }
 0xcea   :  { %v2899_v32 = vadd.f32 %v1155_v37, %v1147_v35 }
 0xcec   :  { %2248 = vtanh.f32 %v2899_v32 }
 0xcf1   :  { %v1172_v40 = vpop.permute.xlu1 %1171 }
 0xcf2   :  { %v2903_v42 = vadd.f32 %v1172_v40, %v1164_v39 }
 0xcf4   :  { %2250 = vtanh.f32 %v2903_v42 }
 0xcf9   :  { %v2249_v47 = vpop.eup %2248 }
 0xcfa   :  { %1160 = vrot.lane.b32.xlu0 %v2249_v47, %s2483_s2 }
 0xd01   :  { %v2251_v43 = vpop.eup %2250 }
 0xd02   :  { %1177 = vrot.lane.b32.xlu1 %v2251_v43, %s2483_s2 }
 0xd6c   :  { %v1161_v44 = vpop.permute.xlu0 %1160 }
 0xd6d   :  { %v1163_v45 = vmul.f32 %v1161_v44, %v1143_v26 }
 0xd6f   :  { %1188 = vrot.lane.b32.xlu1 %v1163_v45, %s2485_s0 }
 0xd74   :  { %v1178_v46 = vpop.permute.xlu1 %1177 }
 0xd75   :  { %v1180_v53 = vmul.f32 %v1178_v46, %v1146_v28 }
 0xd77   :  { %1182 = vrot.lane.b32.xlu0 %v1180_v53, %s2485_s0 }
 0xde1   :  { %v1189_v54 = vpop.permute.xlu1 %1188 }
 0xde2   :  { %2038 = vmatmul.mubr.msk.f32.vlgmr.msra.gmra.mxu1 %vm282_vm1, %v1189_v54 }
 0xde3   :  { %1413 = vmatpush1.msra.mxu1 %v2591_v3  ;;  %1452 = vmatprep.mubr.f32.mxu1 %v2482_v0 }
 0xde4   :  { %1414 = vmatprep.subr.mxu1 %v2600_v5 }
 0xde5   :  { %1415 = vmatpush1.msra.mxu1 %v2609_v7 }
 0xde6   :  { %1416 = vmatprep.subr.mxu1 %v2618_v9 }
 0xde7   :  { %1417 = vmatpush1.msra.mxu1 %v2624_v10 }
 0xde8   :  { %1418 = vmatprep.subr.mxu1 %v2631_v11 }
 0xde9   :  { %v1183_v55 = vpop.permute.xlu0 %1182  ;;  %1419 = vmatpush1.msra.mxu1 %v2637_v12 }
 0xdea   :  { %1186 = vst.msk [vmem:[#allocation13 + $0x18] sm:$0xff] %vm282_vm1, %v1183_v55  ;;  %2165 = vmatmul.mubr.msk.f32.vlgmr.msra.gmra.mxu0 %vm282_vm1, %v1183_v55  ;;  %1608 = vmatprep.subr.mxu1 %v2586_v2 }
 0xdeb   :  { %2168 = vmatpush3.msra.mxu0 %v2674_v33  ;;  %2175 = vmatprep.mubr.msk.f32.mxu0 %vm2484_vm2, %v2482_v0 }
 0xdec   :  { %2169 = vmatprep.subr.mxu0 %v2482_v0 }
 0xded   :  { %2170 = vmatpush3.msra.mxu0 %v2684_v36 }
 0xdee   :  { %2171 = vmatprep.subr.mxu0 %v2482_v0 }
 0xdef   :  { %2172 = vmatpush3.msra.mxu0 %v2691_v38 }
 0xdf0   :  { %2173 = vmatprep.subr.mxu0 %v2482_v0 }
 0xdf1   :  { %2174 = vmatpush3.msra.mxu0 %v2702_v41 }
 0xdf2   :  { %2178 = vmatprep.subr.mxu0 %v2482_v0 }
 0xea2   :  { %v1258_v58 = vpop.f32.mrf.mxu1 }
 0xea3   :  { %v1335_v59 = vadd.f32 %v1258_v58, %v263_v57 }
 0xea4   :  { %v1260_v61 = vpop.f32.mrf.mxu1 }
 0xea5   :  { %2252 = vtanh.f32 %v1335_v59 }
 0xeaa   :  { %v1331_v48 = vpop.f32.mrf.mxu0 }
 0xeab   :  { %v1332_v60 = vadd.f32 %v2751_v56, %v1331_v48 }
 0xeac   :  { %v2166_v62 = vpop.f32.mrf.mxu0 }
 0xead   :  { %v1336_v63 = vadd.f32 %v1332_v60, %v1260_v61 }
 0xeaf   :  { %2254 = vtanh.f32 %v1336_v63 }
 0xeb2   :  { %v2253_v1 = vpop.eup %2252 }
 0xeb3   :  { %v1338_v4 = vmul.f32 %v2253_v1, %v2659_v21 }
 0xeb5   :  { %v1339_v6 = vadd.f32 %v2661_v23, %v1338_v4 }
 0xeb7   :  { %1345 = vrot.lane.b32.xlu0 %v1339_v6, %s2483_s2  ;;  %v1343_v19 = vmul.f32 %v1339_v6, %v2899_v32 }
 0xebc   :  { %v2255_v8 = vpop.eup %2254 }
 0xebd   :  { %v1341_v49 = vmul.f32 %v2255_v8, %v2659_v21 }
 0xebf   :  { %v1342_v13 = vadd.f32 %v2661_v23, %v1341_v49 }
 0xec1   :  { %1362 = vrot.lane.b32.xlu1 %v1342_v13, %s2483_s2  ;;  %v1360_v24 = vmul.f32 %v1342_v13, %v2903_v42 }
 0xf29   :  { %v1346_v14 = vpop.permute.xlu0 %1345 }
 0xf2a   :  { %v1348_v16 = vmul.f32 %v1346_v14, %v1339_v6 }
 0xf2c   :  { %1350 = vrot.lane.b32.xlu0 %v1348_v16, %s2483_s2 }
 0xf33   :  { %v1363_v17 = vpop.permute.xlu1 %1362 }
 0xf34   :  { %v1365_v18 = vmul.f32 %v1363_v17, %v1342_v13 }
 0xf36   :  { %1367 = vrot.lane.b32.xlu1 %v1365_v18, %s2483_s2 }
 0xf9e   :  { %v1351_v20 = vpop.permute.xlu0 %1350 }
 0xf9f   :  { %v2944_v22 = vadd.f32 %v1351_v20, %v1343_v19 }
 0xfa1   :  { %2256 = vtanh.f32 %v2944_v22 }
 0xfa8   :  { %v1368_v25 = vpop.permute.xlu1 %1367 }
 0xfa9   :  { %v2948_v26 = vadd.f32 %v1368_v25, %v1360_v24 }
 0xfab   :  { %2258 = vtanh.f32 %v2948_v26 }
 0xfae   :  { %v2257_v27 = vpop.eup %2256 }
 0xfaf   :  { %1356 = vrot.lane.b32.xlu0 %v2257_v27, %s2483_s2 }
 0xfb8   :  { %v2259_v50 = vpop.eup %2258 }
 0xfb9   :  { %1373 = vrot.lane.b32.xlu1 %v2259_v50, %s2483_s2 }
0x1021   :  { %v1357_v28 = vpop.permute.xlu0 %1356 }
0x1022   :  { %v1359_v29 = vmul.f32 %v1357_v28, %v1339_v6 }
0x1024   :  { %1384 = vrot.lane.b32.xlu1 %v1359_v29, %s2485_s0 }
0x102b   :  { %v1374_v30 = vpop.permute.xlu1 %1373 }
0x102c   :  { %v1376_v31 = vmul.f32 %v1374_v30, %v1342_v13 }
0x102e   :  { %1378 = vrot.lane.b32.xlu0 %v1376_v31, %s2485_s0 }
0x1096   :  { %v1385_v34 = vpop.permute.xlu1 %1384 }
0x1097   :  { %2040 = vmatmul.mubr.msk.f32.vlgmr.msra.gmra.mxu1 %vm282_vm1, %v1385_v34 }
0x1098   :  { %1609 = vmatpush1.msra.mxu1 %v2591_v3  ;;  %1648 = vmatprep.mubr.f32.mxu1 %v2482_v0 }
0x1099   :  { %1610 = vmatprep.subr.mxu1 %v2600_v5 }
0x109a   :  { %1611 = vmatpush1.msra.mxu1 %v2609_v7 }
0x109b   :  { %1612 = vmatprep.subr.mxu1 %v2618_v9 }
0x109c   :  { %1613 = vmatpush1.msra.mxu1 %v2624_v10 }
0x109d   :  { %1614 = vmatprep.subr.mxu1 %v2631_v11 }
0x109e   :  { %1615 = vmatpush1.msra.mxu1 %v2637_v12 }
0x109f   :  { %1804 = vmatprep.subr.mxu1 %v2586_v2  ;;  %v268_v2 = vadd.f32 %v2656_v15, %v2739_v52 }
0x10a0   :  { %v1379_v35 = vpop.permute.xlu0 %1378 }
0x10a1   :  { %1382 = vst.msk [vmem:[#allocation13 + $0x20] sm:$0xff] %vm282_vm1, %v1379_v35  ;;  %2176 = vmatmul.mubr.msk.f32.vlgmr.msra.gmra.mxu0 %vm282_vm1, %v1379_v35 }
0x10a2   :  { %2179 = vmatpush3.msra.mxu0 %v2674_v33  ;;  %2186 = vmatprep.mubr.msk.f32.mxu0 %vm2484_vm2, %v2482_v0 }
0x10a3   :  { %2180 = vmatprep.subr.mxu0 %v2482_v0 }
0x10a4   :  { %2181 = vmatpush3.msra.mxu0 %v2684_v36 }
0x10a5   :  { %2182 = vmatprep.subr.mxu0 %v2482_v0 }
0x10a6   :  { %2183 = vmatpush3.msra.mxu0 %v2691_v38 }
0x10a7   :  { %2184 = vmatprep.subr.mxu0 %v2482_v0 }
0x10a8   :  { %2185 = vmatpush3.msra.mxu0 %v2702_v41 }
0x10a9   :  { %2189 = vmatprep.subr.mxu0 %v2482_v0 }
0x1157   :  { %v1454_v37 = vpop.f32.mrf.mxu1 }
0x1158   :  { %v1531_v32 = vadd.f32 %v1454_v37, %v268_v2 }
0x1159   :  { %v1456_v42 = vpop.f32.mrf.mxu1 }
0x115a   :  { %2260 = vtanh.f32 %v1531_v32 }
0x1161   :  { %v1527_v39 = vpop.f32.mrf.mxu0 }
0x1162   :  { %v1528_v40 = vadd.f32 %v2751_v56, %v1527_v39 }
0x1163   :  { %v2177_v47 = vpop.f32.mrf.mxu0 }
0x1164   :  { %v1532_v43 = vadd.f32 %v1528_v40, %v1456_v42 }
0x1166   :  { %2262 = vtanh.f32 %v1532_v43 }
0x1167   :  { %v2261_v44 = vpop.eup %2260 }
0x1168   :  { %v1534_v45 = vmul.f32 %v2261_v44, %v2659_v21  ;;  %v2280_v44 = vld [vmem:[#allocation8] ss:$0 sm:$0xff] }
0x116a   :  { %v1535_v46 = vadd.f32 %v2661_v23, %v1534_v45 }
0x116c   :  { %1541 = vrot.lane.b32.xlu0 %v1535_v46, %s2483_s2  ;;  %v1539_v48 = vmul.f32 %v1535_v46, %v2944_v22 }
0x1173   :  { %v2263_v53 = vpop.eup %2262 }
0x1174   :  { %v1537_v52 = vmul.f32 %v2263_v53, %v2659_v21 }
0x1176   :  { %v1538_v54 = vadd.f32 %v2661_v23, %v1537_v52 }
0x1178   :  { %1558 = vrot.lane.b32.xlu1 %v1538_v54, %s2483_s2  ;;  %v1556_v62 = vmul.f32 %v1538_v54, %v2948_v26 }
0x11de   :  { %v1542_v55 = vpop.permute.xlu0 %1541 }
0x11df   :  { %v1544_v57 = vmul.f32 %v1542_v55, %v1535_v46 }
0x11e1   :  { %1546 = vrot.lane.b32.xlu0 %v1544_v57, %s2483_s2 }
0x11ea   :  { %v1559_v58 = vpop.permute.xlu1 %1558 }
0x11eb   :  { %v1561_v59 = vmul.f32 %v1559_v58, %v1538_v54 }
0x11ed   :  { %1563 = vrot.lane.b32.xlu1 %v1561_v59, %s2483_s2 }
0x1253   :  { %v1547_v60 = vpop.permute.xlu0 %1546 }
0x1254   :  { %v1549_v61 = vadd.f32 %v1547_v60, %v1539_v48 }
0x1256   :  { %2264 = vtanh.f32 %v1549_v61 }
0x125f   :  { %v1564_v63 = vpop.permute.xlu1 %1563 }
0x1260   :  { %v1566_v1 = vadd.f32 %v1564_v63, %v1556_v62 }
0x1262   :  { %2266 = vtanh.f32 %v1566_v1 }
0x1263   :  { %v2265_v4 = vpop.eup %2264 }
0x1264   :  { %1552 = vrot.lane.b32.xlu0 %v2265_v4, %s2483_s2 }
0x126f   :  { %v2267_v6 = vpop.eup %2266 }
0x1270   :  { %1569 = vrot.lane.b32.xlu1 %v2267_v6, %s2483_s2 }
0x12d6   :  { %v1553_v8 = vpop.permute.xlu0 %1552 }
0x12d7   :  { %v1555_v49 = vmul.f32 %v1553_v8, %v1535_v46  ;;  %v2281_v46 = vld [vmem:[#allocation10] ss:$0 sm:$0xff] }
0x12d9   :  { %1580 = vrot.lane.b32.xlu1 %v1555_v49, %s2485_s0 }
0x12e2   :  { %v1570_v13 = vpop.permute.xlu1 %1569 }
0x12e3   :  { %v1572_v14 = vmul.f32 %v1570_v13, %v1538_v54 }
0x12e5   :  { %1574 = vrot.lane.b32.xlu0 %v1572_v14, %s2485_s0 }
0x134b   :  { %v1581_v16 = vpop.permute.xlu1 %1580 }
0x134c   :  { %2042 = vmatmul.mubr.msk.f32.vlgmr.msra.gmra.mxu1 %vm282_vm1, %v1581_v16 }
0x134d   :  { %1805 = vmatpush1.msra.mxu1 %v2591_v3  ;;  %1844 = vmatprep.mubr.f32.mxu1 %v2482_v0  ;;  %v273_v3 = vadd.f32 %v2737_v51, %v2656_v15 }
0x134e   :  { %1806 = vmatprep.subr.mxu1 %v2600_v5 }
0x134f   :  { %1807 = vmatpush1.msra.mxu1 %v2609_v7 }
0x1350   :  { %1808 = vmatprep.subr.mxu1 %v2618_v9 }
0x1351   :  { %1809 = vmatpush1.msra.mxu1 %v2624_v10 }
0x1352   :  { %1810 = vmatprep.subr.mxu1 %v2631_v11 }
0x1353   :  { %1811 = vmatpush1.msra.mxu1 %v2637_v12 }
0x1357   :  { %v1575_v17 = vpop.permute.xlu0 %1574 }
0x1358   :  { %1578 = vst.msk [vmem:[#allocation13 + $0x28] sm:$0xff] %vm282_vm1, %v1575_v17  ;;  %2187 = vmatmul.mubr.msk.f32.vlgmr.msra.gmra.mxu0 %vm282_vm1, %v1575_v17 }
0x1359   :  { %2190 = vmatpush3.msra.mxu0 %v2674_v33  ;;  %2197 = vmatprep.mubr.msk.f32.mxu0 %vm2484_vm2, %v2482_v0 }
0x135a   :  { %2191 = vmatprep.subr.mxu0 %v2482_v0 }
0x135b   :  { %2192 = vmatpush3.msra.mxu0 %v2684_v36 }
0x135c   :  { %2193 = vmatprep.subr.mxu0 %v2482_v0 }
0x135d   :  { %2194 = vmatpush3.msra.mxu0 %v2691_v38 }
0x135e   :  { %2195 = vmatprep.subr.mxu0 %v2482_v0 }
0x135f   :  { %2196 = vmatpush3.msra.mxu0 %v2702_v41 }
0x140c   :  { %v1650_v5 = vpop.f32.mrf.mxu1 }
0x140d   :  { %v1727_v7 = vadd.f32 %v1650_v5, %v273_v3 }
0x140e   :  { %v1652_v11 = vpop.f32.mrf.mxu1 }
0x140f   :  { %2268 = vtanh.f32 %v1727_v7 }
0x1418   :  { %v1723_v9 = vpop.f32.mrf.mxu0 }
0x1419   :  { %v1724_v10 = vadd.f32 %v2751_v56, %v1723_v9 }
0x141a   :  { %v2188_v12 = vpop.f32.mrf.mxu0 }
0x141b   :  { %v1728_v33 = vadd.f32 %v1724_v10, %v1652_v11 }
0x141c   :  { %v2269_v36 = vpop.eup %2268 }
0x141d   :  { %2270 = vtanh.f32 %v1728_v33  ;;  %v1730_v38 = vmul.f32 %v2269_v36, %v2659_v21 }
0x141f   :  { %v1731_v0 = vadd.f32 %v2661_v23, %v1730_v38 }
0x1421   :  { %1737 = vrot.lane.b32.xlu0 %v1731_v0, %s2483_s2  ;;  %v1735_v24 = vmul.f32 %v1731_v0, %v1549_v61 }
0x142a   :  { %v2271_v41 = vpop.eup %2270 }
0x142b   :  { %v1733_v15 = vmul.f32 %v2271_v41, %v2659_v21 }
0x142d   :  { %v1734_v51 = vadd.f32 %v2661_v23, %v1733_v15 }
0x142f   :  { %1754 = vrot.lane.b32.xlu1 %v1734_v51, %s2483_s2  ;;  %v1752_v27 = vmul.f32 %v1734_v51, %v1566_v1 }
0x1493   :  { %v1738_v18 = vpop.permute.xlu0 %1737 }
0x1494   :  { %v1740_v19 = vmul.f32 %v1738_v18, %v1731_v0 }
0x1496   :  { %1742 = vrot.lane.b32.xlu0 %v1740_v19, %s2483_s2 }
0x14a1   :  { %v1755_v20 = vpop.permute.xlu1 %1754 }
0x14a2   :  { %v1757_v22 = vmul.f32 %v1755_v20, %v1734_v51 }
0x14a4   :  { %1759 = vrot.lane.b32.xlu1 %v1757_v22, %s2483_s2 }
0x1508   :  { %v1743_v25 = vpop.permute.xlu0 %1742 }
0x1509   :  { %v1745_v26 = vadd.f32 %v1743_v25, %v1735_v24 }
0x150b   :  { %2272 = vtanh.f32 %v1745_v26 }
0x1516   :  { %v1760_v50 = vpop.permute.xlu1 %1759 }
0x1517   :  { %v1762_v28 = vadd.f32 %v1760_v50, %v1752_v27 }
0x1518   :  { %v2273_v21 = vpop.eup %2272 }
0x1519   :  { %2274 = vtanh.f32 %v1762_v28  ;;  %1748 = vrot.lane.b32.xlu0 %v2273_v21, %s2483_s2 }
0x1526   :  { %v2275_v23 = vpop.eup %2274 }
0x1527   :  { %1765 = vrot.lane.b32.xlu1 %v2275_v23, %s2483_s2 }
0x158b   :  { %v1749_v29 = vpop.permute.xlu0 %1748 }
0x158c   :  { %v1751_v30 = vmul.f32 %v1749_v29, %v1731_v0 }
0x158e   :  { %1776 = vrot.lane.b32.xlu0 %v1751_v30, %s2485_s0 }
0x1599   :  { %v1766_v31 = vpop.permute.xlu1 %1765 }
0x159a   :  { %v1768_v34 = vmul.f32 %v1766_v31, %v1734_v51 }
0x159c   :  { %1770 = vrot.lane.b32.xlu1 %v1768_v34, %s2485_s0 }
0x1600   :  { %v1777_v35 = vpop.permute.xlu0 %1776 }
0x1601   :  { %1951 = vst.msk [vmem:[#allocation14] sm:$0xff] %vm282_vm1, %v1777_v35  ;;  %2044 = vmatmul.mubr.msk.f32.vlgmr.msra.gmra.mxu1 %vm282_vm1, %v1777_v35 }
0x160e   :  { %v1771_v2 = vpop.permute.xlu1 %1770 }
0x160f   :  { %1774 = vst.msk [vmem:[#allocation13 + $0x30] sm:$0xff] %vm282_vm1, %v1771_v2  ;;  %2198 = vmatmul.mubr.msk.f32.vlgmr.msra.gmra.mxu0 %vm282_vm1, %v1771_v2 }
0x16c1   :  { %v1846_v37 = vpop.f32.mrf.mxu1 }
0x16c3   :  { %v1847_v32 = vpop.f32.mrf.mxu1 }
0x16cf   :  { %v1918_v39 = vpop.f32.mrf.mxu0 }
0x16d0   :  { %v1922_v40 = vadd.f32 %v1918_v39, %v1847_v32 }
0x16d1   :  { %v2199_v42 = vpop.f32.mrf.mxu0 }
0x16d2   :  { %v1923_v47 = vadd.f32 %v2751_v56, %v1922_v40 }
0x16d4   :  { %2276 = vtanh.f32 %v1923_v47 }
0x16e1   :  { %v2277_v43 = vpop.eup %2276 }
0x16e2   :  { %v1925_v45 = vmul.f32 %v2280_v44, %v2277_v43 }
0x16e4   :  { %v1926_v53 = vadd.f32 %v2281_v46, %v1925_v45 }
0x16e6   :  { %1929 = vrot.lane.b32.xlu0 %v1926_v53, %s2483_s2  ;;  %v1927_v55 = vmul.f32 %v1926_v53, %v1762_v28 }
0x1758   :  { %v1930_v52 = vpop.permute.xlu0 %1929 }
0x1759   :  { %v1932_v54 = vmul.f32 %v1930_v52, %v1926_v53 }
0x175b   :  { %1934 = vrot.lane.b32.xlu1 %v1932_v54, %s2483_s2 }
0x17cd   :  { %v1935_v57 = vpop.permute.xlu1 %1934 }
0x17ce   :  { %v1937_v58 = vadd.f32 %v1935_v57, %v1927_v55 }
0x17d0   :  { %2278 = vtanh.f32 %v1937_v58 }
0x17dd   :  { %v2279_v59 = vpop.eup %2278 }
0x17de   :  { %1940 = vrot.lane.b32.xlu0 %v2279_v59, %s2483_s2 }
0x17e2   :  { %1955 = vrot.lane.b32.xlu0 %v1745_v26, %s2486_s9 }
0x1850   :  { %v1941_v56 = vpop.permute.xlu0 %1940 }
0x1851   :  { %v1943_v48 = vmul.f32 %v1941_v56, %v1926_v53 }
0x1853   :  { %1945 = vrot.lane.b32.xlu1 %v1943_v48, %s2485_s0 }
0x1854   :  { %v1956_v60 = vpop.permute.xlu0 %1955 }
0x1855   :  { %1958 = vst.msk [vmem:[#allocation16] sm:$0xff] %vm282_vm1, %v1956_v60 }
0x1857   :  { %1960 = vrot.lane.b32.xlu1 %v1937_v58, %s2486_s9 }
0x18c5   :  { %v1946_v61 = vpop.permute.xlu1 %1945 }
0x18c6   :  { %1949 = vst.msk [vmem:[#allocation13 + $0x38] sm:$0xff] %vm282_vm1, %v1946_v61  ;;  %1953 = vst.msk [vmem:[#allocation14 + $0x8] sm:$0xff] %vm282_vm1, %v1946_v61 }
0x18c7   :  { %2413 = shalt.err (!%p2410_p6)
}
0x18c8   :  { %1988 = dma.vmem_to_hbm [thread:$0]  %s1983_s13, 256, %s3078_s11, [#allocation15], %s2477_s4, %s2477_s4, %s2478_s18  }
0x18c9   :  { %s2422_s19 = scalar_lea.vmem %s1971_s15, 1024  ;;  %p2427_p8 = scmp.lt.s32.totalorder %s1971_s15, %s1971_s15 }
0x18ca   :  { %p2423_p7 = scmp.ne.s32.totalorder %s1971_s15, %s2422_s19  ;;  %p2428_p9 = scmp.lt.s32.totalorder %s2422_s19, %s2422_s19 }
0x18cc   :  { %p2429_p10 = por %p2428_p9, %p2427_p8 }
0x18ce   :  { %p2430_p11 = pnand %p2429_p10, %p2423_p7 }
0x18d0   :  { %2433 = shalt.err (!%p2430_p11)
}
0x18d1   :  { %1976 = dma.vmem_to_hbm [thread:$0]  %s1971_s15, 1024, %s3077_s10, [#allocation4], %s2477_s4, %s2477_s4, %s2478_s18   ;;  %v1961_v62 = vpop.permute.xlu1 %1960 }
0x18d2   :  { %1964 = vst.msk [vmem:[#allocation16 + $0x8] sm:$0xff] %vm282_vm1, %v1961_v62  ;;  %s2442_s11 = scalar_lea.vmem %s3041_s16, 256  ;;  %p2447_p13 = scmp.lt.s32.totalorder %s3041_s16, %s3041_s16 }
0x18d3   :  { %p2443_p12 = scmp.ne.s32.totalorder %s3041_s16, %s2442_s11  ;;  %p2448_p0 = scmp.lt.s32.totalorder %s2442_s11, %s2442_s11 }
0x18d5   :  { %p2449_p1 = por %p2448_p0, %p2447_p13 }
0x18d7   :  { %p2450_p2 = pnand %p2449_p1, %p2443_p12 }
0x18d9   :  { %2453 = shalt.err (!%p2450_p2)
}
0x18da   :  { %2000 = dma.vmem_to_hbm [thread:$0]  %s3041_s16, 256, %s3079_s12, [#allocation15], %s2477_s4, %s2477_s4, %s2478_s18  }
0x18db   :  { %2470 = dma.done.wait [#allocation4], 1024  }
0x18dc   :  { %2471 = vsyncadd [#allocation4], 4294966272 }
0x18dd   :  { %2472 = dma.done.wait [#allocation15], 512  }
0x18de   :  { %2473 = vsyncadd [#allocation15], 4294966784 }
0x18df   :  { %2010 = vsyncpa [#allocation3], 1 }
0x18e0   :  { %2011 = vsyncpa [#allocation6], 1 }
0x18e1   :  { %2012 = vsyncpa [#allocation9], 1 }
0x18e2   :  { %2013 = vsyncpa [#allocation12], 1 }
0x18e3   :  { %2014 = vsyncpa [#allocation4], 1 }
0x18e4   :  { %2015 = vsyncpa [#allocation15], 1 }

</bundles_post_ra>
